<compile_context>
chip_gen: v6e
topology: v6e:2x2x1
jax: 0.10.0
libtpu: 0.0.40
codegen_flags: <defaults>
</compile_context>

<pallas_src>
import numpy as np
import jax
import jax.numpy as jnp
from jax.experimental import pallas as pl
from jax.experimental.pallas import tpu as pltpu


def _gather_rows_kernel(fwd_ref, x_ref, o_ref, sems):
    """Gather one block of kept patch rows via per-row DMAs.

      fwd_ref: SMEM (B, T) int32  — per-batch forward permutation (scalar prefetch)
      x_ref:   HBM  (T*B, C)      — all patches, row-major view (memory_space=pl.ANY)
      o_ref:   VMEM (Rt, B, C)    — output block for kept positions [i*Rt, (i+1)*Rt)
      sems:    DMA semaphores (Rt, B)
    """
    i = pl.program_id(0)
    rt, batch, _ = o_ref.shape
    base = i * rt

    # Issue all row DMAs for this block (rt * B small contiguous copies, all in flight),
    # then wait. Pure data movement: no MXU, no one-hot build, bit-exact.
    copies = []
    for r in range(rt):
        for b in range(batch):
            src_row = fwd_ref[b, base + r] * batch + b   # row index into the (T*B, C) view
            cp = pltpu.make_async_copy(x_ref.at[src_row], o_ref.at[r, b], sems.at[r, b])
            cp.start()
            copies.append(cp)
    for cp in copies:
        cp.wait()


def patch_shuffle_forward(patches, key, *, ratio, row_block=8):
    """PatchShuffle forward. patches: (T, B, C). Returns (kept_patches, fwd_idx, bwd_idx)."""
    T, B, C = patches.shape
    remain_T = int(T * (1 - ratio))   # same rounding as the PyTorch reference

    # ---- glue (plain JAX): per-batch random permutations + inverse permutations ----
    keys = jax.random.split(key, B)
    fwd_bt = jax.vmap(lambda k: jax.random.permutation(k, T))(keys).astype(jnp.int32)  # (B, T)
    bwd_bt = jnp.argsort(fwd_bt, axis=1).astype(jnp.int32)                              # (B, T)
    forward_indexes = fwd_bt.T                                                          # (T, B)
    backward_indexes = bwd_bt.T                                                         # (T, B)

    # row_block must divide remain_T so every output block is fully written (no padding).
    rt = max(1, min(row_block, remain_T))
    while remain_T % rt:
        rt -= 1
    grid = (remain_T // rt,)

    # Free view (leading-dim merge of a row-major array, no HBM traffic).
    x_flat = patches.reshape(T * B, C)

    out = pl.pallas_call(
        _gather_rows_kernel,
        out_shape=jax.ShapeDtypeStruct((remain_T, B, C), patches.dtype),
        grid_spec=pltpu.PrefetchScalarGridSpec(
            num_scalar_prefetch=1,                        # fwd_bt -> SMEM, used in kernel body
            grid=grid,
            in_specs=[pl.BlockSpec(memory_space=pl.ANY)],  # stay in HBM; rows DMA'd manually
            out_specs=pl.BlockSpec((rt, B, C), lambda i, fwd: (i, 0, 0)),
            scratch_shapes=[pltpu.SemaphoreType.DMA((rt, B))],
        ),
        compiler_params=pltpu.CompilerParams(dimension_semantics=("parallel",)),
    )(fwd_bt, x_flat)

    return out, forward_indexes, backward_indexes


if __name__ == "__main__":
    T, B, C = 64, 2, 128
    ratio = 0.75
    remain_T = int(T * (1 - ratio))   # 16

    key = jax.random.PRNGKey(0)
    kx, kperm = jax.random.split(key)
    patches = jax.random.normal(kx, (T, B, C), jnp.float32)

    fwd_fn = jax.jit(patch_shuffle_forward, static_argnames=("ratio", "row_block"))
    out, fwd, bwd = fwd_fn(patches, kperm, ratio=ratio)
    out, fwd, bwd = jax.block_until_ready((out, fwd, bwd))

    # ---- checks ----
    assert out.shape == (remain_T, B, C)
    assert fwd.shape == (T, B) and bwd.shape == (T, B)

    np_patches = np.asarray(patches)
    np_fwd = np.asarray(fwd)
    np_bwd = np.asarray(bwd)

    for b in range(B):
        # forward is a permutation of [0, T) and backward inverts it
        assert np.array_equal(np.sort(np_fwd[:, b]), np.arange(T))
        assert np.array_equal(np_fwd[:, b][np_bwd[:, b]], np.arange(T))

    # reference gather: out[t, b, :] = patches[fwd[t, b], b, :] for t < remain_T
    ref = np.stack(
        [np_patches[np_fwd[:remain_T, b], b, :] for b in range(B)], axis=1
    )
    # Pure-copy gather: must be bit-exact.
    np.testing.assert_array_equal(np.asarray(out), ref)

    print("KERNEL_OK")
</pallas_src>

<mosaic_0001>
module attributes {stable_mosaic.version = 11 : i64} {
  func.func @_gather_rows_kernel(%arg0: i32, %arg1: memref<2x64xi32, #tpu.memory_space<smem>>, %arg2: memref<128x128xf32, #tpu.memory_space<any>>, %arg3: memref<8x2x128xf32, #tpu.memory_space<vmem>>, %arg4: memref<8x2x!tpu.dma_semaphore, #tpu.memory_space<semaphore_mem>>) attributes {dimension_semantics = [#tpu.dimension_semantics<parallel>], iteration_bounds = array<i64: 2>, scalar_prefetch = 1 : i64, scratch_operands = 1 : i64, tpu.core_type = #tpu.core_type<tc>, window_params = [{}, {transform_indices = @transform_1, window_bounds = array<i64: 8, 2, 128>}]} {
    %c8_i32 = arith.constant 8 : i32
    %0 = arith.muli %arg0, %c8_i32 : i32
    %c0_i32 = arith.constant 0 : i32
    %1 = arith.addi %0, %c0_i32 : i32
    %c0 = arith.constant 0 : index
    %2 = arith.index_cast %1 : i32 to index
    %3 = memref.load %arg1[%c0, %2] : memref<2x64xi32, #tpu.memory_space<smem>>
    %c2_i32 = arith.constant 2 : i32
    %4 = arith.muli %3, %c2_i32 : i32
    %c0_i32_0 = arith.constant 0 : i32
    %5 = arith.addi %4, %c0_i32_0 : i32
    %c0_i32_1 = arith.constant 0 : i32
    %c0_i32_2 = arith.constant 0 : i32
    %c0_i32_3 = arith.constant 0 : i32
    %c0_i32_4 = arith.constant 0 : i32
    %c0_i32_5 = arith.constant 0 : i32
    %6 = tpu.memref_slice %arg2[%5, %c0_i32_5] : memref<128x128xf32, #tpu.memory_space<any>> -> memref<1x128xf32, #tpu.memory_space<any>>
    %7 = tpu.memref_squeeze %6 : memref<1x128xf32, #tpu.memory_space<any>> -> memref<128xf32, #tpu.memory_space<any>>
    %c0_i32_6 = arith.constant 0 : i32
    %8 = tpu.memref_slice %arg3[%c0_i32_1, %c0_i32_2, %c0_i32_6] : memref<8x2x128xf32, #tpu.memory_space<vmem>> -> memref<1x1x128xf32, #tpu.memory_space<vmem>>
    %9 = tpu.memref_squeeze %8 : memref<1x1x128xf32, #tpu.memory_space<vmem>> -> memref<128xf32, #tpu.memory_space<vmem>>
    %10 = tpu.memref_slice %arg4[%c0_i32_3, %c0_i32_4] : memref<8x2x!tpu.dma_semaphore, #tpu.memory_space<semaphore_mem>> -> memref<1x1x!tpu.dma_semaphore, #tpu.memory_space<semaphore_mem>>
    %11 = tpu.memref_squeeze %10 : memref<1x1x!tpu.dma_semaphore, #tpu.memory_space<semaphore_mem>> -> memref<!tpu.dma_semaphore, #tpu.memory_space<semaphore_mem>>
    tpu.enqueue_dma source(%7 : memref<128xf32, #tpu.memory_space<any>>) target(%9 : memref<128xf32, #tpu.memory_space<vmem>>) target_semaphore(%11 : memref<!tpu.dma_semaphore, #tpu.memory_space<semaphore_mem>>)
    %c0_i32_7 = arith.constant 0 : i32
    %12 = arith.addi %0, %c0_i32_7 : i32
    %c1 = arith.constant 1 : index
    %13 = arith.index_cast %12 : i32 to index
    %14 = memref.load %arg1[%c1, %13] : memref<2x64xi32, #tpu.memory_space<smem>>
    %c2_i32_8 = arith.constant 2 : i32
    %15 = arith.muli %14, %c2_i32_8 : i32
    %c1_i32 = arith.constant 1 : i32
    %16 = arith.addi %15, %c1_i32 : i32
    %c0_i32_9 = arith.constant 0 : i32
    %c1_i32_10 = arith.constant 1 : i32
    %c0_i32_11 = arith.constant 0 : i32
    %c1_i32_12 = arith.constant 1 : i32
    %c0_i32_13 = arith.constant 0 : i32
    %17 = tpu.memref_slice %arg2[%16, %c0_i32_13] : memref<128x128xf32, #tpu.memory_space<any>> -> memref<1x128xf32, #tpu.memory_space<any>>
    %18 = tpu.memref_squeeze %17 : memref<1x128xf32, #tpu.memory_space<any>> -> memref<128xf32, #tpu.memory_space<any>>
    %c0_i32_14 = arith.constant 0 : i32
    %19 = tpu.memref_slice %arg3[%c0_i32_9, %c1_i32_10, %c0_i32_14] : memref<8x2x128xf32, #tpu.memory_space<vmem>> -> memref<1x1x128xf32, #tpu.memory_space<vmem>>
    %20 = tpu.memref_squeeze %19 : memref<1x1x128xf32, #tpu.memory_space<vmem>> -> memref<128xf32, #tpu.memory_space<vmem>>
    %21 = tpu.memref_slice %arg4[%c0_i32_11, %c1_i32_12] : memref<8x2x!tpu.dma_semaphore, #tpu.memory_space<semaphore_mem>> -> memref<1x1x!tpu.dma_semaphore, #tpu.memory_space<semaphore_mem>>
    %22 = tpu.memref_squeeze %21 : memref<1x1x!tpu.dma_semaphore, #tpu.memory_space<semaphore_mem>> -> memref<!tpu.dma_semaphore, #tpu.memory_space<semaphore_mem>>
    tpu.enqueue_dma source(%18 : memref<128xf32, #tpu.memory_space<any>>) target(%20 : memref<128xf32, #tpu.memory_space<vmem>>) target_semaphore(%22 : memref<!tpu.dma_semaphore, #tpu.memory_space<semaphore_mem>>)
    %c1_i32_15 = arith.constant 1 : i32
    %23 = arith.addi %0, %c1_i32_15 : i32
    %c0_16 = arith.constant 0 : index
    %24 = arith.index_cast %23 : i32 to index
    %25 = memref.load %arg1[%c0_16, %24] : memref<2x64xi32, #tpu.memory_space<smem>>
    %c2_i32_17 = arith.constant 2 : i32
    %26 = arith.muli %25, %c2_i32_17 : i32
    %c0_i32_18 = arith.constant 0 : i32
    %27 = arith.addi %26, %c0_i32_18 : i32
    %c1_i32_19 = arith.constant 1 : i32
    %c0_i32_20 = arith.constant 0 : i32
    %c1_i32_21 = arith.constant 1 : i32
    %c0_i32_22 = arith.constant 0 : i32
    %c0_i32_23 = arith.constant 0 : i32
    %28 = tpu.memref_slice %arg2[%27, %c0_i32_23] : memref<128x128xf32, #tpu.memory_space<any>> -> memref<1x128xf32, #tpu.memory_space<any>>
    %29 = tpu.memref_squeeze %28 : memref<1x128xf32, #tpu.memory_space<any>> -> memref<128xf32, #tpu.memory_space<any>>
    %c0_i32_24 = arith.constant 0 : i32
    %30 = tpu.memref_slice %arg3[%c1_i32_19, %c0_i32_20, %c0_i32_24] : memref<8x2x128xf32, #tpu.memory_space<vmem>> -> memref<1x1x128xf32, #tpu.memory_space<vmem>>
    %31 = tpu.memref_squeeze %30 : memref<1x1x128xf32, #tpu.memory_space<vmem>> -> memref<128xf32, #tpu.memory_space<vmem>>
    %32 = tpu.memref_slice %arg4[%c1_i32_21, %c0_i32_22] : memref<8x2x!tpu.dma_semaphore, #tpu.memory_space<semaphore_mem>> -> memref<1x1x!tpu.dma_semaphore, #tpu.memory_space<semaphore_mem>>
    %33 = tpu.memref_squeeze %32 : memref<1x1x!tpu.dma_semaphore, #tpu.memory_space<semaphore_mem>> -> memref<!tpu.dma_semaphore, #tpu.memory_space<semaphore_mem>>
    tpu.enqueue_dma source(%29 : memref<128xf32, #tpu.memory_space<any>>) target(%31 : memref<128xf32, #tpu.memory_space<vmem>>) target_semaphore(%33 : memref<!tpu.dma_semaphore, #tpu.memory_space<semaphore_mem>>)
    %c1_i32_25 = arith.constant 1 : i32
    %34 = arith.addi %0, %c1_i32_25 : i32
    %c1_26 = arith.constant 1 : index
    %35 = arith.index_cast %34 : i32 to index
    %36 = memref.load %arg1[%c1_26, %35] : memref<2x64xi32, #tpu.memory_space<smem>>
    %c2_i32_27 = arith.constant 2 : i32
    %37 = arith.muli %36, %c2_i32_27 : i32
    %c1_i32_28 = arith.constant 1 : i32
    %38 = arith.addi %37, %c1_i32_28 : i32
    %c1_i32_29 = arith.constant 1 : i32
    %c1_i32_30 = arith.constant 1 : i32
    %c1_i32_31 = arith.constant 1 : i32
    %c1_i32_32 = arith.constant 1 : i32
    %c0_i32_33 = arith.constant 0 : i32
    %39 = tpu.memref_slice %arg2[%38, %c0_i32_33] : memref<128x128xf32, #tpu.memory_space<any>> -> memref<1x128xf32, #tpu.memory_space<any>>
    %40 = tpu.memref_squeeze %39 : memref<1x128xf32, #tpu.memory_space<any>> -> memref<128xf32, #tpu.memory_space<any>>
    %c0_i32_34 = arith.constant 0 : i32
    %41 = tpu.memref_slice %arg3[%c1_i32_29, %c1_i32_30, %c0_i32_34] : memref<8x2x128xf32, #tpu.memory_space<vmem>> -> memref<1x1x128xf32, #tpu.memory_space<vmem>>
    %42 = tpu.memref_squeeze %41 : memref<1x1x128xf32, #tpu.memory_space<vmem>> -> memref<128xf32, #tpu.memory_space<vmem>>
    %43 = tpu.memref_slice %arg4[%c1_i32_31, %c1_i32_32] : memref<8x2x!tpu.dma_semaphore, #tpu.memory_space<semaphore_mem>> -> memref<1x1x!tpu.dma_semaphore, #tpu.memory_space<semaphore_mem>>
    %44 = tpu.memref_squeeze %43 : memref<1x1x!tpu.dma_semaphore, #tpu.memory_space<semaphore_mem>> -> memref<!tpu.dma_semaphore, #tpu.memory_space<semaphore_mem>>
    tpu.enqueue_dma source(%40 : memref<128xf32, #tpu.memory_space<any>>) target(%42 : memref<128xf32, #tpu.memory_space<vmem>>) target_semaphore(%44 : memref<!tpu.dma_semaphore, #tpu.memory_space<semaphore_mem>>)
    %c2_i32_35 = arith.constant 2 : i32
    %45 = arith.addi %0, %c2_i32_35 : i32
    %c0_36 = arith.constant 0 : index
    %46 = arith.index_cast %45 : i32 to index
    %47 = memref.load %arg1[%c0_36, %46] : memref<2x64xi32, #tpu.memory_space<smem>>
    %c2_i32_37 = arith.constant 2 : i32
    %48 = arith.muli %47, %c2_i32_37 : i32
    %c0_i32_38 = arith.constant 0 : i32
    %49 = arith.addi %48, %c0_i32_38 : i32
    %c2_i32_39 = arith.constant 2 : i32
    %c0_i32_40 = arith.constant 0 : i32
    %c2_i32_41 = arith.constant 2 : i32
    %c0_i32_42 = arith.constant 0 : i32
    %c0_i32_43 = arith.constant 0 : i32
    %50 = tpu.memref_slice %arg2[%49, %c0_i32_43] : memref<128x128xf32, #tpu.memory_space<any>> -> memref<1x128xf32, #tpu.memory_space<any>>
    %51 = tpu.memref_squeeze %50 : memref<1x128xf32, #tpu.memory_space<any>> -> memref<128xf32, #tpu.memory_space<any>>
    %c0_i32_44 = arith.constant 0 : i32
    %52 = tpu.memref_slice %arg3[%c2_i32_39, %c0_i32_40, %c0_i32_44] : memref<8x2x128xf32, #tpu.memory_space<vmem>> -> memref<1x1x128xf32, #tpu.memory_space<vmem>>
    %53 = tpu.memref_squeeze %52 : memref<1x1x128xf32, #tpu.memory_space<vmem>> -> memref<128xf32, #tpu.memory_space<vmem>>
    %54 = tpu.memref_slice %arg4[%c2_i32_41, %c0_i32_42] : memref<8x2x!tpu.dma_semaphore, #tpu.memory_space<semaphore_mem>> -> memref<1x1x!tpu.dma_semaphore, #tpu.memory_space<semaphore_mem>>
    %55 = tpu.memref_squeeze %54 : memref<1x1x!tpu.dma_semaphore, #tpu.memory_space<semaphore_mem>> -> memref<!tpu.dma_semaphore, #tpu.memory_space<semaphore_mem>>
    tpu.enqueue_dma source(%51 : memref<128xf32, #tpu.memory_space<any>>) target(%53 : memref<128xf32, #tpu.memory_space<vmem>>) target_semaphore(%55 : memref<!tpu.dma_semaphore, #tpu.memory_space<semaphore_mem>>)
    %c2_i32_45 = arith.constant 2 : i32
    %56 = arith.addi %0, %c2_i32_45 : i32
    %c1_46 = arith.constant 1 : index
    %57 = arith.index_cast %56 : i32 to index
    %58 = memref.load %arg1[%c1_46, %57] : memref<2x64xi32, #tpu.memory_space<smem>>
    %c2_i32_47 = arith.constant 2 : i32
    %59 = arith.muli %58, %c2_i32_47 : i32
    %c1_i32_48 = arith.constant 1 : i32
    %60 = arith.addi %59, %c1_i32_48 : i32
    %c2_i32_49 = arith.constant 2 : i32
    %c1_i32_50 = arith.constant 1 : i32
    %c2_i32_51 = arith.constant 2 : i32
    %c1_i32_52 = arith.constant 1 : i32
    %c0_i32_53 = arith.constant 0 : i32
    %61 = tpu.memref_slice %arg2[%60, %c0_i32_53] : memref<128x128xf32, #tpu.memory_space<any>> -> memref<1x128xf32, #tpu.memory_space<any>>
    %62 = tpu.memref_squeeze %61 : memref<1x128xf32, #tpu.memory_space<any>> -> memref<128xf32, #tpu.memory_space<any>>
    %c0_i32_54 = arith.constant 0 : i32
    %63 = tpu.memref_slice %arg3[%c2_i32_49, %c1_i32_50, %c0_i32_54] : memref<8x2x128xf32, #tpu.memory_space<vmem>> -> memref<1x1x128xf32, #tpu.memory_space<vmem>>
    %64 = tpu.memref_squeeze %63 : memref<1x1x128xf32, #tpu.memory_space<vmem>> -> memref<128xf32, #tpu.memory_space<vmem>>
    %65 = tpu.memref_slice %arg4[%c2_i32_51, %c1_i32_52] : memref<8x2x!tpu.dma_semaphore, #tpu.memory_space<semaphore_mem>> -> memref<1x1x!tpu.dma_semaphore, #tpu.memory_space<semaphore_mem>>
    %66 = tpu.memref_squeeze %65 : memref<1x1x!tpu.dma_semaphore, #tpu.memory_space<semaphore_mem>> -> memref<!tpu.dma_semaphore, #tpu.memory_space<semaphore_mem>>
    tpu.enqueue_dma source(%62 : memref<128xf32, #tpu.memory_space<any>>) target(%64 : memref<128xf32, #tpu.memory_space<vmem>>) target_semaphore(%66 : memref<!tpu.dma_semaphore, #tpu.memory_space<semaphore_mem>>)
    %c3_i32 = arith.constant 3 : i32
    %67 = arith.addi %0, %c3_i32 : i32
    %c0_55 = arith.constant 0 : index
    %68 = arith.index_cast %67 : i32 to index
    %69 = memref.load %arg1[%c0_55, %68] : memref<2x64xi32, #tpu.memory_space<smem>>
    %c2_i32_56 = arith.constant 2 : i32
    %70 = arith.muli %69, %c2_i32_56 : i32
    %c0_i32_57 = arith.constant 0 : i32
    %71 = arith.addi %70, %c0_i32_57 : i32
    %c3_i32_58 = arith.constant 3 : i32
    %c0_i32_59 = arith.constant 0 : i32
    %c3_i32_60 = arith.constant 3 : i32
    %c0_i32_61 = arith.constant 0 : i32
    %c0_i32_62 = arith.constant 0 : i32
    %72 = tpu.memref_slice %arg2[%71, %c0_i32_62] : memref<128x128xf32, #tpu.memory_space<any>> -> memref<1x128xf32, #tpu.memory_space<any>>
    %73 = tpu.memref_squeeze %72 : memref<1x128xf32, #tpu.memory_space<any>> -> memref<128xf32, #tpu.memory_space<any>>
    %c0_i32_63 = arith.constant 0 : i32
    %74 = tpu.memref_slice %arg3[%c3_i32_58, %c0_i32_59, %c0_i32_63] : memref<8x2x128xf32, #tpu.memory_space<vmem>> -> memref<1x1x128xf32, #tpu.memory_space<vmem>>
    %75 = tpu.memref_squeeze %74 : memref<1x1x128xf32, #tpu.memory_space<vmem>> -> memref<128xf32, #tpu.memory_space<vmem>>
    %76 = tpu.memref_slice %arg4[%c3_i32_60, %c0_i32_61] : memref<8x2x!tpu.dma_semaphore, #tpu.memory_space<semaphore_mem>> -> memref<1x1x!tpu.dma_semaphore, #tpu.memory_space<semaphore_mem>>
    %77 = tpu.memref_squeeze %76 : memref<1x1x!tpu.dma_semaphore, #tpu.memory_space<semaphore_mem>> -> memref<!tpu.dma_semaphore, #tpu.memory_space<semaphore_mem>>
    tpu.enqueue_dma source(%73 : memref<128xf32, #tpu.memory_space<any>>) target(%75 : memref<128xf32, #tpu.memory_space<vmem>>) target_semaphore(%77 : memref<!tpu.dma_semaphore, #tpu.memory_space<semaphore_mem>>)
    %c3_i32_64 = arith.constant 3 : i32
    %78 = arith.addi %0, %c3_i32_64 : i32
    %c1_65 = arith.constant 1 : index
    %79 = arith.index_cast %78 : i32 to index
    %80 = memref.load %arg1[%c1_65, %79] : memref<2x64xi32, #tpu.memory_space<smem>>
    %c2_i32_66 = arith.constant 2 : i32
    %81 = arith.muli %80, %c2_i32_66 : i32
    %c1_i32_67 = arith.constant 1 : i32
    %82 = arith.addi %81, %c1_i32_67 : i32
    %c3_i32_68 = arith.constant 3 : i32
    %c1_i32_69 = arith.constant 1 : i32
    %c3_i32_70 = arith.constant 3 : i32
    %c1_i32_71 = arith.constant 1 : i32
    %c0_i32_72 = arith.constant 0 : i32
    %83 = tpu.memref_slice %arg2[%82, %c0_i32_72] : memref<128x128xf32, #tpu.memory_space<any>> -> memref<1x128xf32, #tpu.memory_space<any>>
    %84 = tpu.memref_squeeze %83 : memref<1x128xf32, #tpu.memory_space<any>> -> memref<128xf32, #tpu.memory_space<any>>
    %c0_i32_73 = arith.constant 0 : i32
    %85 = tpu.memref_slice %arg3[%c3_i32_68, %c1_i32_69, %c0_i32_73] : memref<8x2x128xf32, #tpu.memory_space<vmem>> -> memref<1x1x128xf32, #tpu.memory_space<vmem>>
    %86 = tpu.memref_squeeze %85 : memref<1x1x128xf32, #tpu.memory_space<vmem>> -> memref<128xf32, #tpu.memory_space<vmem>>
    %87 = tpu.memref_slice %arg4[%c3_i32_70, %c1_i32_71] : memref<8x2x!tpu.dma_semaphore, #tpu.memory_space<semaphore_mem>> -> memref<1x1x!tpu.dma_semaphore, #tpu.memory_space<semaphore_mem>>
    %88 = tpu.memref_squeeze %87 : memref<1x1x!tpu.dma_semaphore, #tpu.memory_space<semaphore_mem>> -> memref<!tpu.dma_semaphore, #tpu.memory_space<semaphore_mem>>
    tpu.enqueue_dma source(%84 : memref<128xf32, #tpu.memory_space<any>>) target(%86 : memref<128xf32, #tpu.memory_space<vmem>>) target_semaphore(%88 : memref<!tpu.dma_semaphore, #tpu.memory_space<semaphore_mem>>)
    %c4_i32 = arith.constant 4 : i32
    %89 = arith.addi %0, %c4_i32 : i32
    %c0_74 = arith.constant 0 : index
    %90 = arith.index_cast %89 : i32 to index
    %91 = memref.load %arg1[%c0_74, %90] : memref<2x64xi32, #tpu.memory_space<smem>>
    %c2_i32_75 = arith.constant 2 : i32
    %92 = arith.muli %91, %c2_i32_75 : i32
    %c0_i32_76 = arith.constant 0 : i32
    %93 = arith.addi %92, %c0_i32_76 : i32
    %c4_i32_77 = arith.constant 4 : i32
    %c0_i32_78 = arith.constant 0 : i32
    %c4_i32_79 = arith.constant 4 : i32
    %c0_i32_80 = arith.constant 0 : i32
    %c0_i32_81 = arith.constant 0 : i32
    %94 = tpu.memref_slice %arg2[%93, %c0_i32_81] : memref<128x128xf32, #tpu.memory_space<any>> -> memref<1x128xf32, #tpu.memory_space<any>>
    %95 = tpu.memref_squeeze %94 : memref<1x128xf32, #tpu.memory_space<any>> -> memref<128xf32, #tpu.memory_space<any>>
    %c0_i32_82 = arith.constant 0 : i32
    %96 = tpu.memref_slice %arg3[%c4_i32_77, %c0_i32_78, %c0_i32_82] : memref<8x2x128xf32, #tpu.memory_space<vmem>> -> memref<1x1x128xf32, #tpu.memory_space<vmem>>
    %97 = tpu.memref_squeeze %96 : memref<1x1x128xf32, #tpu.memory_space<vmem>> -> memref<128xf32, #tpu.memory_space<vmem>>
    %98 = tpu.memref_slice %arg4[%c4_i32_79, %c0_i32_80] : memref<8x2x!tpu.dma_semaphore, #tpu.memory_space<semaphore_mem>> -> memref<1x1x!tpu.dma_semaphore, #tpu.memory_space<semaphore_mem>>
    %99 = tpu.memref_squeeze %98 : memref<1x1x!tpu.dma_semaphore, #tpu.memory_space<semaphore_mem>> -> memref<!tpu.dma_semaphore, #tpu.memory_space<semaphore_mem>>
    tpu.enqueue_dma source(%95 : memref<128xf32, #tpu.memory_space<any>>) target(%97 : memref<128xf32, #tpu.memory_space<vmem>>) target_semaphore(%99 : memref<!tpu.dma_semaphore, #tpu.memory_space<semaphore_mem>>)
    %c4_i32_83 = arith.constant 4 : i32
    %100 = arith.addi %0, %c4_i32_83 : i32
    %c1_84 = arith.constant 1 : index
    %101 = arith.index_cast %100 : i32 to index
    %102 = memref.load %arg1[%c1_84, %101] : memref<2x64xi32, #tpu.memory_space<smem>>
    %c2_i32_85 = arith.constant 2 : i32
    %103 = arith.muli %102, %c2_i32_85 : i32
    %c1_i32_86 = arith.constant 1 : i32
    %104 = arith.addi %103, %c1_i32_86 : i32
    %c4_i32_87 = arith.constant 4 : i32
    %c1_i32_88 = arith.constant 1 : i32
    %c4_i32_89 = arith.constant 4 : i32
    %c1_i32_90 = arith.constant 1 : i32
    %c0_i32_91 = arith.constant 0 : i32
    %105 = tpu.memref_slice %arg2[%104, %c0_i32_91] : memref<128x128xf32, #tpu.memory_space<any>> -> memref<1x128xf32, #tpu.memory_space<any>>
    %106 = tpu.memref_squeeze %105 : memref<1x128xf32, #tpu.memory_space<any>> -> memref<128xf32, #tpu.memory_space<any>>
    %c0_i32_92 = arith.constant 0 : i32
    %107 = tpu.memref_slice %arg3[%c4_i32_87, %c1_i32_88, %c0_i32_92] : memref<8x2x128xf32, #tpu.memory_space<vmem>> -> memref<1x1x128xf32, #tpu.memory_space<vmem>>
    %108 = tpu.memref_squeeze %107 : memref<1x1x128xf32, #tpu.memory_space<vmem>> -> memref<128xf32, #tpu.memory_space<vmem>>
    %109 = tpu.memref_slice %arg4[%c4_i32_89, %c1_i32_90] : memref<8x2x!tpu.dma_semaphore, #tpu.memory_space<semaphore_mem>> -> memref<1x1x!tpu.dma_semaphore, #tpu.memory_space<semaphore_mem>>
    %110 = tpu.memref_squeeze %109 : memref<1x1x!tpu.dma_semaphore, #tpu.memory_space<semaphore_mem>> -> memref<!tpu.dma_semaphore, #tpu.memory_space<semaphore_mem>>
    tpu.enqueue_dma source(%106 : memref<128xf32, #tpu.memory_space<any>>) target(%108 : memref<128xf32, #tpu.memory_space<vmem>>) target_semaphore(%110 : memref<!tpu.dma_semaphore, #tpu.memory_space<semaphore_mem>>)
    %c5_i32 = arith.constant 5 : i32
    %111 = arith.addi %0, %c5_i32 : i32
    %c0_93 = arith.constant 0 : index
    %112 = arith.index_cast %111 : i32 to index
    %113 = memref.load %arg1[%c0_93, %112] : memref<2x64xi32, #tpu.memory_space<smem>>
    %c2_i32_94 = arith.constant 2 : i32
    %114 = arith.muli %113, %c2_i32_94 : i32
    %c0_i32_95 = arith.constant 0 : i32
    %115 = arith.addi %114, %c0_i32_95 : i32
    %c5_i32_96 = arith.constant 5 : i32
    %c0_i32_97 = arith.constant 0 : i32
    %c5_i32_98 = arith.constant 5 : i32
    %c0_i32_99 = arith.constant 0 : i32
    %c0_i32_100 = arith.constant 0 : i32
    %116 = tpu.memref_slice %arg2[%115, %c0_i32_100] : memref<128x128xf32, #tpu.memory_space<any>> -> memref<1x128xf32, #tpu.memory_space<any>>
    %117 = tpu.memref_squeeze %116 : memref<1x128xf32, #tpu.memory_space<any>> -> memref<128xf32, #tpu.memory_space<any>>
    %c0_i32_101 = arith.constant 0 : i32
    %118 = tpu.memref_slice %arg3[%c5_i32_96, %c0_i32_97, %c0_i32_101] : memref<8x2x128xf32, #tpu.memory_space<vmem>> -> memref<1x1x128xf32, #tpu.memory_space<vmem>>
    %119 = tpu.memref_squeeze %118 : memref<1x1x128xf32, #tpu.memory_space<vmem>> -> memref<128xf32, #tpu.memory_space<vmem>>
    %120 = tpu.memref_slice %arg4[%c5_i32_98, %c0_i32_99] : memref<8x2x!tpu.dma_semaphore, #tpu.memory_space<semaphore_mem>> -> memref<1x1x!tpu.dma_semaphore, #tpu.memory_space<semaphore_mem>>
    %121 = tpu.memref_squeeze %120 : memref<1x1x!tpu.dma_semaphore, #tpu.memory_space<semaphore_mem>> -> memref<!tpu.dma_semaphore, #tpu.memory_space<semaphore_mem>>
    tpu.enqueue_dma source(%117 : memref<128xf32, #tpu.memory_space<any>>) target(%119 : memref<128xf32, #tpu.memory_space<vmem>>) target_semaphore(%121 : memref<!tpu.dma_semaphore, #tpu.memory_space<semaphore_mem>>)
    %c5_i32_102 = arith.constant 5 : i32
    %122 = arith.addi %0, %c5_i32_102 : i32
    %c1_103 = arith.constant 1 : index
    %123 = arith.index_cast %122 : i32 to index
    %124 = memref.load %arg1[%c1_103, %123] : memref<2x64xi32, #tpu.memory_space<smem>>
    %c2_i32_104 = arith.constant 2 : i32
    %125 = arith.muli %124, %c2_i32_104 : i32
    %c1_i32_105 = arith.constant 1 : i32
    %126 = arith.addi %125, %c1_i32_105 : i32
    %c5_i32_106 = arith.constant 5 : i32
    %c1_i32_107 = arith.constant 1 : i32
    %c5_i32_108 = arith.constant 5 : i32
    %c1_i32_109 = arith.constant 1 : i32
    %c0_i32_110 = arith.constant 0 : i32
    %127 = tpu.memref_slice %arg2[%126, %c0_i32_110] : memref<128x128xf32, #tpu.memory_space<any>> -> memref<1x128xf32, #tpu.memory_space<any>>
    %128 = tpu.memref_squeeze %127 : memref<1x128xf32, #tpu.memory_space<any>> -> memref<128xf32, #tpu.memory_space<any>>
    %c0_i32_111 = arith.constant 0 : i32
    %129 = tpu.memref_slice %arg3[%c5_i32_106, %c1_i32_107, %c0_i32_111] : memref<8x2x128xf32, #tpu.memory_space<vmem>> -> memref<1x1x128xf32, #tpu.memory_space<vmem>>
    %130 = tpu.memref_squeeze %129 : memref<1x1x128xf32, #tpu.memory_space<vmem>> -> memref<128xf32, #tpu.memory_space<vmem>>
    %131 = tpu.memref_slice %arg4[%c5_i32_108, %c1_i32_109] : memref<8x2x!tpu.dma_semaphore, #tpu.memory_space<semaphore_mem>> -> memref<1x1x!tpu.dma_semaphore, #tpu.memory_space<semaphore_mem>>
    %132 = tpu.memref_squeeze %131 : memref<1x1x!tpu.dma_semaphore, #tpu.memory_space<semaphore_mem>> -> memref<!tpu.dma_semaphore, #tpu.memory_space<semaphore_mem>>
    tpu.enqueue_dma source(%128 : memref<128xf32, #tpu.memory_space<any>>) target(%130 : memref<128xf32, #tpu.memory_space<vmem>>) target_semaphore(%132 : memref<!tpu.dma_semaphore, #tpu.memory_space<semaphore_mem>>)
    %c6_i32 = arith.constant 6 : i32
    %133 = arith.addi %0, %c6_i32 : i32
    %c0_112 = arith.constant 0 : index
    %134 = arith.index_cast %133 : i32 to index
    %135 = memref.load %arg1[%c0_112, %134] : memref<2x64xi32, #tpu.memory_space<smem>>
    %c2_i32_113 = arith.constant 2 : i32
    %136 = arith.muli %135, %c2_i32_113 : i32
    %c0_i32_114 = arith.constant 0 : i32
    %137 = arith.addi %136, %c0_i32_114 : i32
    %c6_i32_115 = arith.constant 6 : i32
    %c0_i32_116 = arith.constant 0 : i32
    %c6_i32_117 = arith.constant 6 : i32
    %c0_i32_118 = arith.constant 0 : i32
    %c0_i32_119 = arith.constant 0 : i32
    %138 = tpu.memref_slice %arg2[%137, %c0_i32_119] : memref<128x128xf32, #tpu.memory_space<any>> -> memref<1x128xf32, #tpu.memory_space<any>>
    %139 = tpu.memref_squeeze %138 : memref<1x128xf32, #tpu.memory_space<any>> -> memref<128xf32, #tpu.memory_space<any>>
    %c0_i32_120 = arith.constant 0 : i32
    %140 = tpu.memref_slice %arg3[%c6_i32_115, %c0_i32_116, %c0_i32_120] : memref<8x2x128xf32, #tpu.memory_space<vmem>> -> memref<1x1x128xf32, #tpu.memory_space<vmem>>
    %141 = tpu.memref_squeeze %140 : memref<1x1x128xf32, #tpu.memory_space<vmem>> -> memref<128xf32, #tpu.memory_space<vmem>>
    %142 = tpu.memref_slice %arg4[%c6_i32_117, %c0_i32_118] : memref<8x2x!tpu.dma_semaphore, #tpu.memory_space<semaphore_mem>> -> memref<1x1x!tpu.dma_semaphore, #tpu.memory_space<semaphore_mem>>
    %143 = tpu.memref_squeeze %142 : memref<1x1x!tpu.dma_semaphore, #tpu.memory_space<semaphore_mem>> -> memref<!tpu.dma_semaphore, #tpu.memory_space<semaphore_mem>>
    tpu.enqueue_dma source(%139 : memref<128xf32, #tpu.memory_space<any>>) target(%141 : memref<128xf32, #tpu.memory_space<vmem>>) target_semaphore(%143 : memref<!tpu.dma_semaphore, #tpu.memory_space<semaphore_mem>>)
    %c6_i32_121 = arith.constant 6 : i32
    %144 = arith.addi %0, %c6_i32_121 : i32
    %c1_122 = arith.constant 1 : index
    %145 = arith.index_cast %144 : i32 to index
    %146 = memref.load %arg1[%c1_122, %145] : memref<2x64xi32, #tpu.memory_space<smem>>
    %c2_i32_123 = arith.constant 2 : i32
    %147 = arith.muli %146, %c2_i32_123 : i32
    %c1_i32_124 = arith.constant 1 : i32
    %148 = arith.addi %147, %c1_i32_124 : i32
    %c6_i32_125 = arith.constant 6 : i32
    %c1_i32_126 = arith.constant 1 : i32
    %c6_i32_127 = arith.constant 6 : i32
    %c1_i32_128 = arith.constant 1 : i32
    %c0_i32_129 = arith.constant 0 : i32
    %149 = tpu.memref_slice %arg2[%148, %c0_i32_129] : memref<128x128xf32, #tpu.memory_space<any>> -> memref<1x128xf32, #tpu.memory_space<any>>
    %150 = tpu.memref_squeeze %149 : memref<1x128xf32, #tpu.memory_space<any>> -> memref<128xf32, #tpu.memory_space<any>>
    %c0_i32_130 = arith.constant 0 : i32
    %151 = tpu.memref_slice %arg3[%c6_i32_125, %c1_i32_126, %c0_i32_130] : memref<8x2x128xf32, #tpu.memory_space<vmem>> -> memref<1x1x128xf32, #tpu.memory_space<vmem>>
    %152 = tpu.memref_squeeze %151 : memref<1x1x128xf32, #tpu.memory_space<vmem>> -> memref<128xf32, #tpu.memory_space<vmem>>
    %153 = tpu.memref_slice %arg4[%c6_i32_127, %c1_i32_128] : memref<8x2x!tpu.dma_semaphore, #tpu.memory_space<semaphore_mem>> -> memref<1x1x!tpu.dma_semaphore, #tpu.memory_space<semaphore_mem>>
    %154 = tpu.memref_squeeze %153 : memref<1x1x!tpu.dma_semaphore, #tpu.memory_space<semaphore_mem>> -> memref<!tpu.dma_semaphore, #tpu.memory_space<semaphore_mem>>
    tpu.enqueue_dma source(%150 : memref<128xf32, #tpu.memory_space<any>>) target(%152 : memref<128xf32, #tpu.memory_space<vmem>>) target_semaphore(%154 : memref<!tpu.dma_semaphore, #tpu.memory_space<semaphore_mem>>)
    %c7_i32 = arith.constant 7 : i32
    %155 = arith.addi %0, %c7_i32 : i32
    %c0_131 = arith.constant 0 : index
    %156 = arith.index_cast %155 : i32 to index
    %157 = memref.load %arg1[%c0_131, %156] : memref<2x64xi32, #tpu.memory_space<smem>>
    %c2_i32_132 = arith.constant 2 : i32
    %158 = arith.muli %157, %c2_i32_132 : i32
    %c0_i32_133 = arith.constant 0 : i32
    %159 = arith.addi %158, %c0_i32_133 : i32
    %c7_i32_134 = arith.constant 7 : i32
    %c0_i32_135 = arith.constant 0 : i32
    %c7_i32_136 = arith.constant 7 : i32
    %c0_i32_137 = arith.constant 0 : i32
    %c0_i32_138 = arith.constant 0 : i32
    %160 = tpu.memref_slice %arg2[%159, %c0_i32_138] : memref<128x128xf32, #tpu.memory_space<any>> -> memref<1x128xf32, #tpu.memory_space<any>>
    %161 = tpu.memref_squeeze %160 : memref<1x128xf32, #tpu.memory_space<any>> -> memref<128xf32, #tpu.memory_space<any>>
    %c0_i32_139 = arith.constant 0 : i32
    %162 = tpu.memref_slice %arg3[%c7_i32_134, %c0_i32_135, %c0_i32_139] : memref<8x2x128xf32, #tpu.memory_space<vmem>> -> memref<1x1x128xf32, #tpu.memory_space<vmem>>
    %163 = tpu.memref_squeeze %162 : memref<1x1x128xf32, #tpu.memory_space<vmem>> -> memref<128xf32, #tpu.memory_space<vmem>>
    %164 = tpu.memref_slice %arg4[%c7_i32_136, %c0_i32_137] : memref<8x2x!tpu.dma_semaphore, #tpu.memory_space<semaphore_mem>> -> memref<1x1x!tpu.dma_semaphore, #tpu.memory_space<semaphore_mem>>
    %165 = tpu.memref_squeeze %164 : memref<1x1x!tpu.dma_semaphore, #tpu.memory_space<semaphore_mem>> -> memref<!tpu.dma_semaphore, #tpu.memory_space<semaphore_mem>>
    tpu.enqueue_dma source(%161 : memref<128xf32, #tpu.memory_space<any>>) target(%163 : memref<128xf32, #tpu.memory_space<vmem>>) target_semaphore(%165 : memref<!tpu.dma_semaphore, #tpu.memory_space<semaphore_mem>>)
    %c7_i32_140 = arith.constant 7 : i32
    %166 = arith.addi %0, %c7_i32_140 : i32
    %c1_141 = arith.constant 1 : index
    %167 = arith.index_cast %166 : i32 to index
    %168 = memref.load %arg1[%c1_141, %167] : memref<2x64xi32, #tpu.memory_space<smem>>
    %c2_i32_142 = arith.constant 2 : i32
    %169 = arith.muli %168, %c2_i32_142 : i32
    %c1_i32_143 = arith.constant 1 : i32
    %170 = arith.addi %169, %c1_i32_143 : i32
    %c7_i32_144 = arith.constant 7 : i32
    %c1_i32_145 = arith.constant 1 : i32
    %c7_i32_146 = arith.constant 7 : i32
    %c1_i32_147 = arith.constant 1 : i32
    %c0_i32_148 = arith.constant 0 : i32
    %171 = tpu.memref_slice %arg2[%170, %c0_i32_148] : memref<128x128xf32, #tpu.memory_space<any>> -> memref<1x128xf32, #tpu.memory_space<any>>
    %172 = tpu.memref_squeeze %171 : memref<1x128xf32, #tpu.memory_space<any>> -> memref<128xf32, #tpu.memory_space<any>>
    %c0_i32_149 = arith.constant 0 : i32
    %173 = tpu.memref_slice %arg3[%c7_i32_144, %c1_i32_145, %c0_i32_149] : memref<8x2x128xf32, #tpu.memory_space<vmem>> -> memref<1x1x128xf32, #tpu.memory_space<vmem>>
    %174 = tpu.memref_squeeze %173 : memref<1x1x128xf32, #tpu.memory_space<vmem>> -> memref<128xf32, #tpu.memory_space<vmem>>
    %175 = tpu.memref_slice %arg4[%c7_i32_146, %c1_i32_147] : memref<8x2x!tpu.dma_semaphore, #tpu.memory_space<semaphore_mem>> -> memref<1x1x!tpu.dma_semaphore, #tpu.memory_space<semaphore_mem>>
    %176 = tpu.memref_squeeze %175 : memref<1x1x!tpu.dma_semaphore, #tpu.memory_space<semaphore_mem>> -> memref<!tpu.dma_semaphore, #tpu.memory_space<semaphore_mem>>
    tpu.enqueue_dma source(%172 : memref<128xf32, #tpu.memory_space<any>>) target(%174 : memref<128xf32, #tpu.memory_space<vmem>>) target_semaphore(%176 : memref<!tpu.dma_semaphore, #tpu.memory_space<semaphore_mem>>)
    %c0_i32_150 = arith.constant 0 : i32
    %c0_i32_151 = arith.constant 0 : i32
    %c0_i32_152 = arith.constant 0 : i32
    %c0_i32_153 = arith.constant 0 : i32
    %c0_i32_154 = arith.constant 0 : i32
    %177 = tpu.memref_slice %arg2[%5, %c0_i32_154] : memref<128x128xf32, #tpu.memory_space<any>> -> memref<1x128xf32, #tpu.memory_space<any>>
    %178 = tpu.memref_squeeze %177 : memref<1x128xf32, #tpu.memory_space<any>> -> memref<128xf32, #tpu.memory_space<any>>
    %c0_i32_155 = arith.constant 0 : i32
    %179 = tpu.memref_slice %arg3[%c0_i32_150, %c0_i32_151, %c0_i32_155] : memref<8x2x128xf32, #tpu.memory_space<vmem>> -> memref<1x1x128xf32, #tpu.memory_space<vmem>>
    %180 = tpu.memref_squeeze %179 : memref<1x1x128xf32, #tpu.memory_space<vmem>> -> memref<128xf32, #tpu.memory_space<vmem>>
    %181 = tpu.memref_slice %arg4[%c0_i32_152, %c0_i32_153] : memref<8x2x!tpu.dma_semaphore, #tpu.memory_space<semaphore_mem>> -> memref<1x1x!tpu.dma_semaphore, #tpu.memory_space<semaphore_mem>>
    %182 = tpu.memref_squeeze %181 : memref<1x1x!tpu.dma_semaphore, #tpu.memory_space<semaphore_mem>> -> memref<!tpu.dma_semaphore, #tpu.memory_space<semaphore_mem>>
    tpu.wait_dma2 semaphore(%182 : memref<!tpu.dma_semaphore, #tpu.memory_space<semaphore_mem>>) src(%178 : memref<128xf32, #tpu.memory_space<any>>) dst(%180 : memref<128xf32, #tpu.memory_space<vmem>>)
    %c0_i32_156 = arith.constant 0 : i32
    %c1_i32_157 = arith.constant 1 : i32
    %c0_i32_158 = arith.constant 0 : i32
    %c1_i32_159 = arith.constant 1 : i32
    %c0_i32_160 = arith.constant 0 : i32
    %183 = tpu.memref_slice %arg2[%16, %c0_i32_160] : memref<128x128xf32, #tpu.memory_space<any>> -> memref<1x128xf32, #tpu.memory_space<any>>
    %184 = tpu.memref_squeeze %183 : memref<1x128xf32, #tpu.memory_space<any>> -> memref<128xf32, #tpu.memory_space<any>>
    %c0_i32_161 = arith.constant 0 : i32
    %185 = tpu.memref_slice %arg3[%c0_i32_156, %c1_i32_157, %c0_i32_161] : memref<8x2x128xf32, #tpu.memory_space<vmem>> -> memref<1x1x128xf32, #tpu.memory_space<vmem>>
    %186 = tpu.memref_squeeze %185 : memref<1x1x128xf32, #tpu.memory_space<vmem>> -> memref<128xf32, #tpu.memory_space<vmem>>
    %187 = tpu.memref_slice %arg4[%c0_i32_158, %c1_i32_159] : memref<8x2x!tpu.dma_semaphore, #tpu.memory_space<semaphore_mem>> -> memref<1x1x!tpu.dma_semaphore, #tpu.memory_space<semaphore_mem>>
    %188 = tpu.memref_squeeze %187 : memref<1x1x!tpu.dma_semaphore, #tpu.memory_space<semaphore_mem>> -> memref<!tpu.dma_semaphore, #tpu.memory_space<semaphore_mem>>
    tpu.wait_dma2 semaphore(%188 : memref<!tpu.dma_semaphore, #tpu.memory_space<semaphore_mem>>) src(%184 : memref<128xf32, #tpu.memory_space<any>>) dst(%186 : memref<128xf32, #tpu.memory_space<vmem>>)
    %c1_i32_162 = arith.constant 1 : i32
    %c0_i32_163 = arith.constant 0 : i32
    %c1_i32_164 = arith.constant 1 : i32
    %c0_i32_165 = arith.constant 0 : i32
    %c0_i32_166 = arith.constant 0 : i32
    %189 = tpu.memref_slice %arg2[%27, %c0_i32_166] : memref<128x128xf32, #tpu.memory_space<any>> -> memref<1x128xf32, #tpu.memory_space<any>>
    %190 = tpu.memref_squeeze %189 : memref<1x128xf32, #tpu.memory_space<any>> -> memref<128xf32, #tpu.memory_space<any>>
    %c0_i32_167 = arith.constant 0 : i32
    %191 = tpu.memref_slice %arg3[%c1_i32_162, %c0_i32_163, %c0_i32_167] : memref<8x2x128xf32, #tpu.memory_space<vmem>> -> memref<1x1x128xf32, #tpu.memory_space<vmem>>
    %192 = tpu.memref_squeeze %191 : memref<1x1x128xf32, #tpu.memory_space<vmem>> -> memref<128xf32, #tpu.memory_space<vmem>>
    %193 = tpu.memref_slice %arg4[%c1_i32_164, %c0_i32_165] : memref<8x2x!tpu.dma_semaphore, #tpu.memory_space<semaphore_mem>> -> memref<1x1x!tpu.dma_semaphore, #tpu.memory_space<semaphore_mem>>
    %194 = tpu.memref_squeeze %193 : memref<1x1x!tpu.dma_semaphore, #tpu.memory_space<semaphore_mem>> -> memref<!tpu.dma_semaphore, #tpu.memory_space<semaphore_mem>>
    tpu.wait_dma2 semaphore(%194 : memref<!tpu.dma_semaphore, #tpu.memory_space<semaphore_mem>>) src(%190 : memref<128xf32, #tpu.memory_space<any>>) dst(%192 : memref<128xf32, #tpu.memory_space<vmem>>)
    %c1_i32_168 = arith.constant 1 : i32
    %c1_i32_169 = arith.constant 1 : i32
    %c1_i32_170 = arith.constant 1 : i32
    %c1_i32_171 = arith.constant 1 : i32
    %c0_i32_172 = arith.constant 0 : i32
    %195 = tpu.memref_slice %arg2[%38, %c0_i32_172] : memref<128x128xf32, #tpu.memory_space<any>> -> memref<1x128xf32, #tpu.memory_space<any>>
    %196 = tpu.memref_squeeze %195 : memref<1x128xf32, #tpu.memory_space<any>> -> memref<128xf32, #tpu.memory_space<any>>
    %c0_i32_173 = arith.constant 0 : i32
    %197 = tpu.memref_slice %arg3[%c1_i32_168, %c1_i32_169, %c0_i32_173] : memref<8x2x128xf32, #tpu.memory_space<vmem>> -> memref<1x1x128xf32, #tpu.memory_space<vmem>>
    %198 = tpu.memref_squeeze %197 : memref<1x1x128xf32, #tpu.memory_space<vmem>> -> memref<128xf32, #tpu.memory_space<vmem>>
    %199 = tpu.memref_slice %arg4[%c1_i32_170, %c1_i32_171] : memref<8x2x!tpu.dma_semaphore, #tpu.memory_space<semaphore_mem>> -> memref<1x1x!tpu.dma_semaphore, #tpu.memory_space<semaphore_mem>>
    %200 = tpu.memref_squeeze %199 : memref<1x1x!tpu.dma_semaphore, #tpu.memory_space<semaphore_mem>> -> memref<!tpu.dma_semaphore, #tpu.memory_space<semaphore_mem>>
    tpu.wait_dma2 semaphore(%200 : memref<!tpu.dma_semaphore, #tpu.memory_space<semaphore_mem>>) src(%196 : memref<128xf32, #tpu.memory_space<any>>) dst(%198 : memref<128xf32, #tpu.memory_space<vmem>>)
    %c2_i32_174 = arith.constant 2 : i32
    %c0_i32_175 = arith.constant 0 : i32
    %c2_i32_176 = arith.constant 2 : i32
    %c0_i32_177 = arith.constant 0 : i32
    %c0_i32_178 = arith.constant 0 : i32
    %201 = tpu.memref_slice %arg2[%49, %c0_i32_178] : memref<128x128xf32, #tpu.memory_space<any>> -> memref<1x128xf32, #tpu.memory_space<any>>
    %202 = tpu.memref_squeeze %201 : memref<1x128xf32, #tpu.memory_space<any>> -> memref<128xf32, #tpu.memory_space<any>>
    %c0_i32_179 = arith.constant 0 : i32
    %203 = tpu.memref_slice %arg3[%c2_i32_174, %c0_i32_175, %c0_i32_179] : memref<8x2x128xf32, #tpu.memory_space<vmem>> -> memref<1x1x128xf32, #tpu.memory_space<vmem>>
    %204 = tpu.memref_squeeze %203 : memref<1x1x128xf32, #tpu.memory_space<vmem>> -> memref<128xf32, #tpu.memory_space<vmem>>
    %205 = tpu.memref_slice %arg4[%c2_i32_176, %c0_i32_177] : memref<8x2x!tpu.dma_semaphore, #tpu.memory_space<semaphore_mem>> -> memref<1x1x!tpu.dma_semaphore, #tpu.memory_space<semaphore_mem>>
    %206 = tpu.memref_squeeze %205 : memref<1x1x!tpu.dma_semaphore, #tpu.memory_space<semaphore_mem>> -> memref<!tpu.dma_semaphore, #tpu.memory_space<semaphore_mem>>
    tpu.wait_dma2 semaphore(%206 : memref<!tpu.dma_semaphore, #tpu.memory_space<semaphore_mem>>) src(%202 : memref<128xf32, #tpu.memory_space<any>>) dst(%204 : memref<128xf32, #tpu.memory_space<vmem>>)
    %c2_i32_180 = arith.constant 2 : i32
    %c1_i32_181 = arith.constant 1 : i32
    %c2_i32_182 = arith.constant 2 : i32
    %c1_i32_183 = arith.constant 1 : i32
    %c0_i32_184 = arith.constant 0 : i32
    %207 = tpu.memref_slice %arg2[%60, %c0_i32_184] : memref<128x128xf32, #tpu.memory_space<any>> -> memref<1x128xf32, #tpu.memory_space<any>>
    %208 = tpu.memref_squeeze %207 : memref<1x128xf32, #tpu.memory_space<any>> -> memref<128xf32, #tpu.memory_space<any>>
    %c0_i32_185 = arith.constant 0 : i32
    %209 = tpu.memref_slice %arg3[%c2_i32_180, %c1_i32_181, %c0_i32_185] : memref<8x2x128xf32, #tpu.memory_space<vmem>> -> memref<1x1x128xf32, #tpu.memory_space<vmem>>
    %210 = tpu.memref_squeeze %209 : memref<1x1x128xf32, #tpu.memory_space<vmem>> -> memref<128xf32, #tpu.memory_space<vmem>>
    %211 = tpu.memref_slice %arg4[%c2_i32_182, %c1_i32_183] : memref<8x2x!tpu.dma_semaphore, #tpu.memory_space<semaphore_mem>> -> memref<1x1x!tpu.dma_semaphore, #tpu.memory_space<semaphore_mem>>
    %212 = tpu.memref_squeeze %211 : memref<1x1x!tpu.dma_semaphore, #tpu.memory_space<semaphore_mem>> -> memref<!tpu.dma_semaphore, #tpu.memory_space<semaphore_mem>>
    tpu.wait_dma2 semaphore(%212 : memref<!tpu.dma_semaphore, #tpu.memory_space<semaphore_mem>>) src(%208 : memref<128xf32, #tpu.memory_space<any>>) dst(%210 : memref<128xf32, #tpu.memory_space<vmem>>)
    %c3_i32_186 = arith.constant 3 : i32
    %c0_i32_187 = arith.constant 0 : i32
    %c3_i32_188 = arith.constant 3 : i32
    %c0_i32_189 = arith.constant 0 : i32
    %c0_i32_190 = arith.constant 0 : i32
    %213 = tpu.memref_slice %arg2[%71, %c0_i32_190] : memref<128x128xf32, #tpu.memory_space<any>> -> memref<1x128xf32, #tpu.memory_space<any>>
    %214 = tpu.memref_squeeze %213 : memref<1x128xf32, #tpu.memory_space<any>> -> memref<128xf32, #tpu.memory_space<any>>
    %c0_i32_191 = arith.constant 0 : i32
    %215 = tpu.memref_slice %arg3[%c3_i32_186, %c0_i32_187, %c0_i32_191] : memref<8x2x128xf32, #tpu.memory_space<vmem>> -> memref<1x1x128xf32, #tpu.memory_space<vmem>>
    %216 = tpu.memref_squeeze %215 : memref<1x1x128xf32, #tpu.memory_space<vmem>> -> memref<128xf32, #tpu.memory_space<vmem>>
    %217 = tpu.memref_slice %arg4[%c3_i32_188, %c0_i32_189] : memref<8x2x!tpu.dma_semaphore, #tpu.memory_space<semaphore_mem>> -> memref<1x1x!tpu.dma_semaphore, #tpu.memory_space<semaphore_mem>>
    %218 = tpu.memref_squeeze %217 : memref<1x1x!tpu.dma_semaphore, #tpu.memory_space<semaphore_mem>> -> memref<!tpu.dma_semaphore, #tpu.memory_space<semaphore_mem>>
    tpu.wait_dma2 semaphore(%218 : memref<!tpu.dma_semaphore, #tpu.memory_space<semaphore_mem>>) src(%214 : memref<128xf32, #tpu.memory_space<any>>) dst(%216 : memref<128xf32, #tpu.memory_space<vmem>>)
    %c3_i32_192 = arith.constant 3 : i32
    %c1_i32_193 = arith.constant 1 : i32
    %c3_i32_194 = arith.constant 3 : i32
    %c1_i32_195 = arith.constant 1 : i32
    %c0_i32_196 = arith.constant 0 : i32
    %219 = tpu.memref_slice %arg2[%82, %c0_i32_196] : memref<128x128xf32, #tpu.memory_space<any>> -> memref<1x128xf32, #tpu.memory_space<any>>
    %220 = tpu.memref_squeeze %219 : memref<1x128xf32, #tpu.memory_space<any>> -> memref<128xf32, #tpu.memory_space<any>>
    %c0_i32_197 = arith.constant 0 : i32
    %221 = tpu.memref_slice %arg3[%c3_i32_192, %c1_i32_193, %c0_i32_197] : memref<8x2x128xf32, #tpu.memory_space<vmem>> -> memref<1x1x128xf32, #tpu.memory_space<vmem>>
    %222 = tpu.memref_squeeze %221 : memref<1x1x128xf32, #tpu.memory_space<vmem>> -> memref<128xf32, #tpu.memory_space<vmem>>
    %223 = tpu.memref_slice %arg4[%c3_i32_194, %c1_i32_195] : memref<8x2x!tpu.dma_semaphore, #tpu.memory_space<semaphore_mem>> -> memref<1x1x!tpu.dma_semaphore, #tpu.memory_space<semaphore_mem>>
    %224 = tpu.memref_squeeze %223 : memref<1x1x!tpu.dma_semaphore, #tpu.memory_space<semaphore_mem>> -> memref<!tpu.dma_semaphore, #tpu.memory_space<semaphore_mem>>
    tpu.wait_dma2 semaphore(%224 : memref<!tpu.dma_semaphore, #tpu.memory_space<semaphore_mem>>) src(%220 : memref<128xf32, #tpu.memory_space<any>>) dst(%222 : memref<128xf32, #tpu.memory_space<vmem>>)
    %c4_i32_198 = arith.constant 4 : i32
    %c0_i32_199 = arith.constant 0 : i32
    %c4_i32_200 = arith.constant 4 : i32
    %c0_i32_201 = arith.constant 0 : i32
    %c0_i32_202 = arith.constant 0 : i32
    %225 = tpu.memref_slice %arg2[%93, %c0_i32_202] : memref<128x128xf32, #tpu.memory_space<any>> -> memref<1x128xf32, #tpu.memory_space<any>>
    %226 = tpu.memref_squeeze %225 : memref<1x128xf32, #tpu.memory_space<any>> -> memref<128xf32, #tpu.memory_space<any>>
    %c0_i32_203 = arith.constant 0 : i32
    %227 = tpu.memref_slice %arg3[%c4_i32_198, %c0_i32_199, %c0_i32_203] : memref<8x2x128xf32, #tpu.memory_space<vmem>> -> memref<1x1x128xf32, #tpu.memory_space<vmem>>
    %228 = tpu.memref_squeeze %227 : memref<1x1x128xf32, #tpu.memory_space<vmem>> -> memref<128xf32, #tpu.memory_space<vmem>>
    %229 = tpu.memref_slice %arg4[%c4_i32_200, %c0_i32_201] : memref<8x2x!tpu.dma_semaphore, #tpu.memory_space<semaphore_mem>> -> memref<1x1x!tpu.dma_semaphore, #tpu.memory_space<semaphore_mem>>
    %230 = tpu.memref_squeeze %229 : memref<1x1x!tpu.dma_semaphore, #tpu.memory_space<semaphore_mem>> -> memref<!tpu.dma_semaphore, #tpu.memory_space<semaphore_mem>>
    tpu.wait_dma2 semaphore(%230 : memref<!tpu.dma_semaphore, #tpu.memory_space<semaphore_mem>>) src(%226 : memref<128xf32, #tpu.memory_space<any>>) dst(%228 : memref<128xf32, #tpu.memory_space<vmem>>)
    %c4_i32_204 = arith.constant 4 : i32
    %c1_i32_205 = arith.constant 1 : i32
    %c4_i32_206 = arith.constant 4 : i32
    %c1_i32_207 = arith.constant 1 : i32
    %c0_i32_208 = arith.constant 0 : i32
    %231 = tpu.memref_slice %arg2[%104, %c0_i32_208] : memref<128x128xf32, #tpu.memory_space<any>> -> memref<1x128xf32, #tpu.memory_space<any>>
    %232 = tpu.memref_squeeze %231 : memref<1x128xf32, #tpu.memory_space<any>> -> memref<128xf32, #tpu.memory_space<any>>
    %c0_i32_209 = arith.constant 0 : i32
    %233 = tpu.memref_slice %arg3[%c4_i32_204, %c1_i32_205, %c0_i32_209] : memref<8x2x128xf32, #tpu.memory_space<vmem>> -> memref<1x1x128xf32, #tpu.memory_space<vmem>>
    %234 = tpu.memref_squeeze %233 : memref<1x1x128xf32, #tpu.memory_space<vmem>> -> memref<128xf32, #tpu.memory_space<vmem>>
    %235 = tpu.memref_slice %arg4[%c4_i32_206, %c1_i32_207] : memref<8x2x!tpu.dma_semaphore, #tpu.memory_space<semaphore_mem>> -> memref<1x1x!tpu.dma_semaphore, #tpu.memory_space<semaphore_mem>>
    %236 = tpu.memref_squeeze %235 : memref<1x1x!tpu.dma_semaphore, #tpu.memory_space<semaphore_mem>> -> memref<!tpu.dma_semaphore, #tpu.memory_space<semaphore_mem>>
    tpu.wait_dma2 semaphore(%236 : memref<!tpu.dma_semaphore, #tpu.memory_space<semaphore_mem>>) src(%232 : memref<128xf32, #tpu.memory_space<any>>) dst(%234 : memref<128xf32, #tpu.memory_space<vmem>>)
    %c5_i32_210 = arith.constant 5 : i32
    %c0_i32_211 = arith.constant 0 : i32
    %c5_i32_212 = arith.constant 5 : i32
    %c0_i32_213 = arith.constant 0 : i32
    %c0_i32_214 = arith.constant 0 : i32
    %237 = tpu.memref_slice %arg2[%115, %c0_i32_214] : memref<128x128xf32, #tpu.memory_space<any>> -> memref<1x128xf32, #tpu.memory_space<any>>
    %238 = tpu.memref_squeeze %237 : memref<1x128xf32, #tpu.memory_space<any>> -> memref<128xf32, #tpu.memory_space<any>>
    %c0_i32_215 = arith.constant 0 : i32
    %239 = tpu.memref_slice %arg3[%c5_i32_210, %c0_i32_211, %c0_i32_215] : memref<8x2x128xf32, #tpu.memory_space<vmem>> -> memref<1x1x128xf32, #tpu.memory_space<vmem>>
    %240 = tpu.memref_squeeze %239 : memref<1x1x128xf32, #tpu.memory_space<vmem>> -> memref<128xf32, #tpu.memory_space<vmem>>
    %241 = tpu.memref_slice %arg4[%c5_i32_212, %c0_i32_213] : memref<8x2x!tpu.dma_semaphore, #tpu.memory_space<semaphore_mem>> -> memref<1x1x!tpu.dma_semaphore, #tpu.memory_space<semaphore_mem>>
    %242 = tpu.memref_squeeze %241 : memref<1x1x!tpu.dma_semaphore, #tpu.memory_space<semaphore_mem>> -> memref<!tpu.dma_semaphore, #tpu.memory_space<semaphore_mem>>
    tpu.wait_dma2 semaphore(%242 : memref<!tpu.dma_semaphore, #tpu.memory_space<semaphore_mem>>) src(%238 : memref<128xf32, #tpu.memory_space<any>>) dst(%240 : memref<128xf32, #tpu.memory_space<vmem>>)
    %c5_i32_216 = arith.constant 5 : i32
    %c1_i32_217 = arith.constant 1 : i32
    %c5_i32_218 = arith.constant 5 : i32
    %c1_i32_219 = arith.constant 1 : i32
    %c0_i32_220 = arith.constant 0 : i32
    %243 = tpu.memref_slice %arg2[%126, %c0_i32_220] : memref<128x128xf32, #tpu.memory_space<any>> -> memref<1x128xf32, #tpu.memory_space<any>>
    %244 = tpu.memref_squeeze %243 : memref<1x128xf32, #tpu.memory_space<any>> -> memref<128xf32, #tpu.memory_space<any>>
    %c0_i32_221 = arith.constant 0 : i32
    %245 = tpu.memref_slice %arg3[%c5_i32_216, %c1_i32_217, %c0_i32_221] : memref<8x2x128xf32, #tpu.memory_space<vmem>> -> memref<1x1x128xf32, #tpu.memory_space<vmem>>
    %246 = tpu.memref_squeeze %245 : memref<1x1x128xf32, #tpu.memory_space<vmem>> -> memref<128xf32, #tpu.memory_space<vmem>>
    %247 = tpu.memref_slice %arg4[%c5_i32_218, %c1_i32_219] : memref<8x2x!tpu.dma_semaphore, #tpu.memory_space<semaphore_mem>> -> memref<1x1x!tpu.dma_semaphore, #tpu.memory_space<semaphore_mem>>
    %248 = tpu.memref_squeeze %247 : memref<1x1x!tpu.dma_semaphore, #tpu.memory_space<semaphore_mem>> -> memref<!tpu.dma_semaphore, #tpu.memory_space<semaphore_mem>>
    tpu.wait_dma2 semaphore(%248 : memref<!tpu.dma_semaphore, #tpu.memory_space<semaphore_mem>>) src(%244 : memref<128xf32, #tpu.memory_space<any>>) dst(%246 : memref<128xf32, #tpu.memory_space<vmem>>)
    %c6_i32_222 = arith.constant 6 : i32
    %c0_i32_223 = arith.constant 0 : i32
    %c6_i32_224 = arith.constant 6 : i32
    %c0_i32_225 = arith.constant 0 : i32
    %c0_i32_226 = arith.constant 0 : i32
    %249 = tpu.memref_slice %arg2[%137, %c0_i32_226] : memref<128x128xf32, #tpu.memory_space<any>> -> memref<1x128xf32, #tpu.memory_space<any>>
    %250 = tpu.memref_squeeze %249 : memref<1x128xf32, #tpu.memory_space<any>> -> memref<128xf32, #tpu.memory_space<any>>
    %c0_i32_227 = arith.constant 0 : i32
    %251 = tpu.memref_slice %arg3[%c6_i32_222, %c0_i32_223, %c0_i32_227] : memref<8x2x128xf32, #tpu.memory_space<vmem>> -> memref<1x1x128xf32, #tpu.memory_space<vmem>>
    %252 = tpu.memref_squeeze %251 : memref<1x1x128xf32, #tpu.memory_space<vmem>> -> memref<128xf32, #tpu.memory_space<vmem>>
    %253 = tpu.memref_slice %arg4[%c6_i32_224, %c0_i32_225] : memref<8x2x!tpu.dma_semaphore, #tpu.memory_space<semaphore_mem>> -> memref<1x1x!tpu.dma_semaphore, #tpu.memory_space<semaphore_mem>>
    %254 = tpu.memref_squeeze %253 : memref<1x1x!tpu.dma_semaphore, #tpu.memory_space<semaphore_mem>> -> memref<!tpu.dma_semaphore, #tpu.memory_space<semaphore_mem>>
    tpu.wait_dma2 semaphore(%254 : memref<!tpu.dma_semaphore, #tpu.memory_space<semaphore_mem>>) src(%250 : memref<128xf32, #tpu.memory_space<any>>) dst(%252 : memref<128xf32, #tpu.memory_space<vmem>>)
    %c6_i32_228 = arith.constant 6 : i32
    %c1_i32_229 = arith.constant 1 : i32
    %c6_i32_230 = arith.constant 6 : i32
    %c1_i32_231 = arith.constant 1 : i32
    %c0_i32_232 = arith.constant 0 : i32
    %255 = tpu.memref_slice %arg2[%148, %c0_i32_232] : memref<128x128xf32, #tpu.memory_space<any>> -> memref<1x128xf32, #tpu.memory_space<any>>
    %256 = tpu.memref_squeeze %255 : memref<1x128xf32, #tpu.memory_space<any>> -> memref<128xf32, #tpu.memory_space<any>>
    %c0_i32_233 = arith.constant 0 : i32
    %257 = tpu.memref_slice %arg3[%c6_i32_228, %c1_i32_229, %c0_i32_233] : memref<8x2x128xf32, #tpu.memory_space<vmem>> -> memref<1x1x128xf32, #tpu.memory_space<vmem>>
    %258 = tpu.memref_squeeze %257 : memref<1x1x128xf32, #tpu.memory_space<vmem>> -> memref<128xf32, #tpu.memory_space<vmem>>
    %259 = tpu.memref_slice %arg4[%c6_i32_230, %c1_i32_231] : memref<8x2x!tpu.dma_semaphore, #tpu.memory_space<semaphore_mem>> -> memref<1x1x!tpu.dma_semaphore, #tpu.memory_space<semaphore_mem>>
    %260 = tpu.memref_squeeze %259 : memref<1x1x!tpu.dma_semaphore, #tpu.memory_space<semaphore_mem>> -> memref<!tpu.dma_semaphore, #tpu.memory_space<semaphore_mem>>
    tpu.wait_dma2 semaphore(%260 : memref<!tpu.dma_semaphore, #tpu.memory_space<semaphore_mem>>) src(%256 : memref<128xf32, #tpu.memory_space<any>>) dst(%258 : memref<128xf32, #tpu.memory_space<vmem>>)
    %c7_i32_234 = arith.constant 7 : i32
    %c0_i32_235 = arith.constant 0 : i32
    %c7_i32_236 = arith.constant 7 : i32
    %c0_i32_237 = arith.constant 0 : i32
    %c0_i32_238 = arith.constant 0 : i32
    %261 = tpu.memref_slice %arg2[%159, %c0_i32_238] : memref<128x128xf32, #tpu.memory_space<any>> -> memref<1x128xf32, #tpu.memory_space<any>>
    %262 = tpu.memref_squeeze %261 : memref<1x128xf32, #tpu.memory_space<any>> -> memref<128xf32, #tpu.memory_space<any>>
    %c0_i32_239 = arith.constant 0 : i32
    %263 = tpu.memref_slice %arg3[%c7_i32_234, %c0_i32_235, %c0_i32_239] : memref<8x2x128xf32, #tpu.memory_space<vmem>> -> memref<1x1x128xf32, #tpu.memory_space<vmem>>
    %264 = tpu.memref_squeeze %263 : memref<1x1x128xf32, #tpu.memory_space<vmem>> -> memref<128xf32, #tpu.memory_space<vmem>>
    %265 = tpu.memref_slice %arg4[%c7_i32_236, %c0_i32_237] : memref<8x2x!tpu.dma_semaphore, #tpu.memory_space<semaphore_mem>> -> memref<1x1x!tpu.dma_semaphore, #tpu.memory_space<semaphore_mem>>
    %266 = tpu.memref_squeeze %265 : memref<1x1x!tpu.dma_semaphore, #tpu.memory_space<semaphore_mem>> -> memref<!tpu.dma_semaphore, #tpu.memory_space<semaphore_mem>>
    tpu.wait_dma2 semaphore(%266 : memref<!tpu.dma_semaphore, #tpu.memory_space<semaphore_mem>>) src(%262 : memref<128xf32, #tpu.memory_space<any>>) dst(%264 : memref<128xf32, #tpu.memory_space<vmem>>)
    %c7_i32_240 = arith.constant 7 : i32
    %c1_i32_241 = arith.constant 1 : i32
    %c7_i32_242 = arith.constant 7 : i32
    %c1_i32_243 = arith.constant 1 : i32
    %c0_i32_244 = arith.constant 0 : i32
    %267 = tpu.memref_slice %arg2[%170, %c0_i32_244] : memref<128x128xf32, #tpu.memory_space<any>> -> memref<1x128xf32, #tpu.memory_space<any>>
    %268 = tpu.memref_squeeze %267 : memref<1x128xf32, #tpu.memory_space<any>> -> memref<128xf32, #tpu.memory_space<any>>
    %c0_i32_245 = arith.constant 0 : i32
    %269 = tpu.memref_slice %arg3[%c7_i32_240, %c1_i32_241, %c0_i32_245] : memref<8x2x128xf32, #tpu.memory_space<vmem>> -> memref<1x1x128xf32, #tpu.memory_space<vmem>>
    %270 = tpu.memref_squeeze %269 : memref<1x1x128xf32, #tpu.memory_space<vmem>> -> memref<128xf32, #tpu.memory_space<vmem>>
    %271 = tpu.memref_slice %arg4[%c7_i32_242, %c1_i32_243] : memref<8x2x!tpu.dma_semaphore, #tpu.memory_space<semaphore_mem>> -> memref<1x1x!tpu.dma_semaphore, #tpu.memory_space<semaphore_mem>>
    %272 = tpu.memref_squeeze %271 : memref<1x1x!tpu.dma_semaphore, #tpu.memory_space<semaphore_mem>> -> memref<!tpu.dma_semaphore, #tpu.memory_space<semaphore_mem>>
    tpu.wait_dma2 semaphore(%272 : memref<!tpu.dma_semaphore, #tpu.memory_space<semaphore_mem>>) src(%268 : memref<128xf32, #tpu.memory_space<any>>) dst(%270 : memref<128xf32, #tpu.memory_space<vmem>>)
    return
  }
  func.func @transform_1(%arg0: i32, %arg1: memref<2x64xi32, #tpu.memory_space<smem>>) -> (i32, i32, i32) {
    %c0_i32 = arith.constant 0 : i32
    %c0_i32_0 = arith.constant 0 : i32
    %c0_i32_1 = arith.constant 0 : i32
    return %arg0, %c0_i32, %c0_i32_0 : i32, i32, i32
  }
}

</mosaic_0001>

<bundles_post_ra>
// kernel: patch_shuffle_forward.1
= control target key start
LH: loop header
LB: loop body
LE: loop exit
PB: predicated region body
PF: predicated region fallthrough
CT: control target
= control target key end

     0   :  { %s1803_s0 = inlined_call_operand.vmem [shape: s32[2,64], index: 0, kind: input, shape index: {}]   ;;  %s1804_s1 = inlined_call_operand.vmem [shape: f32[128,128], index: 1, kind: input, shape index: {}]   ;;  %s1805_s2 = inlined_call_operand.hbm [shape: f32[16,2,128], index: 2, kind: output, shape index: {}]  }
   0x1   :  { %s7_s11 = sshll.u32 %s1803_s0, 4  ;;  %s8_s11 = int_to_ptr.vmem [resolvable:$true] %s7_s11 }
   0x2   :  { %s1514_s12 = scalar_lea.vmem %s8_s11, 32  ;;  %p1519_p1 = scmp.lt.s32.totalorder %s8_s11, %s8_s11 }
   0x3   :  { %p1515_p0 = scmp.ne.s32.totalorder %s8_s11, %s1514_s12  ;;  %p1520_p2 = scmp.lt.s32.totalorder %s1514_s12, %s1514_s12 }
   0x5   :  { %p1521_p3 = por %p1520_p2, %p1519_p1 }
   0x7   :  { %p1522_p4 = pnand %p1521_p3, %p1515_p0 }
   0x9   :  { %1525 = shalt.err (!%p1522_p4)  }
   0xa   :  { %s1614_s13 = smov [#allocation4]  }
   0xb   :  { %10 = dma.vmem_to_smem %s8_s11, 32, %s1614_s13, [#allocation3] }
   0xc   :  { %1564 = dma.done.wait [#allocation3], 32 }
   0xd   :  { %1565 = vsyncadd [#allocation3], 4294967264 }
   0xe   :  { %12 = sfence }
   0xf   :  { %13 = vsyncpa [#allocation6], 0 }
  0x10   :  { %15 = vsyncpa [#allocation6 + $0x1], 0  ;;  %s1636_s14 = smov 0   ;;  %s1638_s15 = smov 0  }
  0x11   :  { %s1640_s0 = smov 0  }
  0x12 LB: > { %s1367_s16 = sadd.s32 4294967295, %s1612_s0   ;;  %s1653_s17 = sadd.s32 1, %s1612_s0   ;;  %s1612_s0 = sphi %s1640_s0, %s1810_s0   ;;  %s1608_s15 = sphi %s1638_s15, %s1809_s15   ;;  %s1604_s14 = sphi %s1636_s14, %s1808_s14  }
  0x13   : > { %s24_s18 = ssub.s32 %s1612_s0, %s1653_s17  ;;  %s27_s19 = sadd.s32 1, %s1608_s15 }
  0x14   : > { %p25_p5 = scmp.eq.s32.totalorder %s24_s18, 0  ;;  %p1368_p6 = scmp.ne.s32.totalorder %s24_s18, 0 }
  0x15   : > { %p31_p7 = scmp.eq.s32.totalorder %s1612_s0, 1  ;;  %p36_p8 = scmp.ne.s32.totalorder %s1608_s15, %s1604_s14 }
  0x16   : > { %s1662_s20 = scalar_select %p25_p5, %s1608_s15, %s27_s19  }
  0x17   : > { %p1664_p9 = por %p1368_p6, %p31_p7  ;;  %p37_p10 = scmp.eq.s32.totalorder %s1367_s16, 1 }
  0x18   : > { %p1369_p12 = scmp.ge.s32.totalorder %s1612_s0, 2 }
  0x19   : > { %p1668_p11 = por %p37_p10, %p36_p8  ;;  %s1674_s23 = sshll.u32 (!%p1369_p12), %s1612_s0, 3 }
  0x1a   : > { %46 = sbr.rel (%p1369_p12) target bundleno = 282 (0x11a), region = 12  ;;  %s51_s24 = sand.u32 (!%p1369_p12), 1, %s1608_s15  }
  0x1b   : > { %s56_s25 = sld [smem:[#allocation4 + %s1674_s23]] (!%p1369_p12)  ;;  %s1370_s26 = sshll.u32 (!%p1369_p12), %s51_s24, 4 }
  0x1c   : > { %s1683_s3 = scalar_lea.vmem (!%p1369_p12), [#allocation5], %s1370_s26 }
  0x21   : > { %s1372_s27 = sshll.u32 %s56_s25, 1 }
  0x22   : > { %s58_s30 = scalar_lea.vmem %s1804_s1, %s1372_s27 }
  0x23   : > { %v77_v0 = vld [vmem:[%s58_s30] sm:$0x1] }
  0x24   : > { %78 = vst [vmem:[%s1683_s3] sm:$0x1] %v77_v0 }
  0x25   : > { %104 = vsyncadd [#allocation2], 16  ;;  %s105_s4 = sshra.s32 %s1674_s23, 7  ;;  %s110_s5 = sand.u32 127, %s1674_s23 }
  0x26   : > { %s1463_s6 = sshll.u32 %s105_s4, 7 }
  0x27   : > { %s1464_s7 = sadd.s32 128, %s1463_s6 }
  0x28   : > { %s111_s8 = sadd.s32 %s1464_s7, %s110_s5 }
  0x29   : > { %s112_s9 = sld [smem:[#allocation4 + %s111_s8]] }
  0x2f   : > { %s1374_s10 = sshll.u32 %s112_s9, 1 }
  0x30   : > { %s1130_s13 = scalar_lea.vmem %s1804_s1, %s1374_s10 }
  0x31   : > { %v1377_v1 = vld [vmem:[%s1130_s13 + $0x1] sm:$0x1] }
  0x32   : > { %1378 = vst [vmem:[%s1683_s3 + $0x1] sm:$0x1] %v1377_v1 }
  0x33   : > { %163 = vsyncadd [#allocation2 + $0x1], 16  ;;  %s164_s16 = sadd.s32 1, %s1674_s23 }
  0x34   : > { %s165_s18 = sld [smem:[#allocation4 + %s164_s16]] }
  0x3a   : > { %s1379_s19 = sshll.u32 %s165_s18, 1 }
  0x3b   : > { %s167_s27 = scalar_lea.vmem %s1804_s1, %s1379_s19 }
  0x3c   : > { %v188_v2 = vld [vmem:[%s167_s27] sm:$0x1] }
  0x3d   : > { %1381 = vst [vmem:[%s1683_s3 + $0x2] sm:$0x1] %v188_v2 }
  0x3e   : > { %215 = vsyncadd [#allocation2 + $0x2], 16  ;;  %s216_s28 = sshra.s32 %s164_s16, 7  ;;  %s221_s29 = sand.u32 127, %s164_s16 }
  0x3f   : > { %s1465_s30 = sshll.u32 %s216_s28, 7 }
  0x40   : > { %s1466_s4 = sadd.s32 128, %s1465_s30 }
  0x41   : > { %s222_s5 = sadd.s32 %s1466_s4, %s221_s29 }
  0x42   : > { %s223_s6 = sld [smem:[#allocation4 + %s222_s5]] }
  0x48   : > { %s1383_s7 = sshll.u32 %s223_s6, 1 }
  0x49   : > { %s1142_s10 = scalar_lea.vmem %s1804_s1, %s1383_s7 }
  0x4a   : > { %v1386_v3 = vld [vmem:[%s1142_s10 + $0x1] sm:$0x1] }
  0x4b   : > { %1387 = vst [vmem:[%s1683_s3 + $0x3] sm:$0x1] %v1386_v3 }
  0x4c   : > { %274 = vsyncadd [#allocation2 + $0x3], 16  ;;  %s275_s11 = sadd.s32 2, %s1674_s23 }
  0x4d   : > { %s276_s12 = sld [smem:[#allocation4 + %s275_s11]] }
  0x53   : > { %s1388_s13 = sshll.u32 %s276_s12, 1 }
  0x54   : > { %s278_s16 = scalar_lea.vmem %s1804_s1, %s1388_s13 }
  0x55   : > { %v299_v4 = vld [vmem:[%s278_s16] sm:$0x1] }
  0x56   : > { %1390 = vst [vmem:[%s1683_s3 + $0x4] sm:$0x1] %v299_v4 }
  0x57   : > { %326 = vsyncadd [#allocation2 + $0x4], 16  ;;  %s327_s25 = sshra.s32 %s275_s11, 7  ;;  %s332_s26 = sand.u32 127, %s275_s11 }
  0x58   : > { %s1467_s27 = sshll.u32 %s327_s25, 7 }
  0x59   : > { %s1468_s28 = sadd.s32 128, %s1467_s27 }
  0x5a   : > { %s333_s29 = sadd.s32 %s1468_s28, %s332_s26 }
  0x5b   : > { %s334_s30 = sld [smem:[#allocation4 + %s333_s29]] }
  0x61   : > { %s1392_s4 = sshll.u32 %s334_s30, 1 }
  0x62   : > { %s1154_s7 = scalar_lea.vmem %s1804_s1, %s1392_s4 }
  0x63   : > { %v1395_v5 = vld [vmem:[%s1154_s7 + $0x1] sm:$0x1] }
  0x64   : > { %1396 = vst [vmem:[%s1683_s3 + $0x5] sm:$0x1] %v1395_v5 }
  0x65   : > { %385 = vsyncadd [#allocation2 + $0x5], 16  ;;  %s386_s8 = sadd.s32 3, %s1674_s23 }
  0x66   : > { %s387_s9 = sld [smem:[#allocation4 + %s386_s8]] }
  0x6c   : > { %s1397_s10 = sshll.u32 %s387_s9, 1 }
  0x6d   : > { %s389_s11 = scalar_lea.vmem %s1804_s1, %s1397_s10 }
  0x6e   : > { %v410_v6 = vld [vmem:[%s389_s11] sm:$0x1] }
  0x6f   : > { %1399 = vst [vmem:[%s1683_s3 + $0x6] sm:$0x1] %v410_v6 }
  0x70   : > { %437 = vsyncadd [#allocation2 + $0x6], 16  ;;  %s438_s18 = sshra.s32 %s386_s8, 7  ;;  %s443_s19 = sand.u32 127, %s386_s8 }
  0x71   : > { %s1469_s16 = sshll.u32 %s438_s18, 7 }
  0x72   : > { %s1470_s25 = sadd.s32 128, %s1469_s16 }
  0x73   : > { %s444_s26 = sadd.s32 %s1470_s25, %s443_s19 }
  0x74   : > { %s445_s27 = sld [smem:[#allocation4 + %s444_s26]] }
  0x7a   : > { %s1401_s28 = sshll.u32 %s445_s27, 1 }
  0x7b   : > { %s1166_s4 = scalar_lea.vmem %s1804_s1, %s1401_s28 }
  0x7c   : > { %v1404_v7 = vld [vmem:[%s1166_s4 + $0x1] sm:$0x1] }
  0x7d   : > { %1405 = vst [vmem:[%s1683_s3 + $0x7] sm:$0x1] %v1404_v7 }
  0x7e   : > { %496 = vsyncadd [#allocation2 + $0x7], 16  ;;  %s497_s5 = sadd.s32 4, %s1674_s23 }
  0x7f   : > { %s498_s6 = sld [smem:[#allocation4 + %s497_s5]] }
  0x85   : > { %s1406_s7 = sshll.u32 %s498_s6, 1 }
  0x86   : > { %s500_s8 = scalar_lea.vmem %s1804_s1, %s1406_s7 }
  0x87   : > { %v521_v8 = vld [vmem:[%s500_s8] sm:$0x1] }
  0x88   : > { %1408 = vst [vmem:[%s1683_s3 + $0x8] sm:$0x1] %v521_v8 }
  0x89   : > { %548 = vsyncadd [#allocation2 + $0x8], 16  ;;  %s549_s12 = sshra.s32 %s497_s5, 7  ;;  %s554_s13 = sand.u32 127, %s497_s5 }
  0x8a   : > { %s1471_s11 = sshll.u32 %s549_s12, 7 }
  0x8b   : > { %s1472_s18 = sadd.s32 128, %s1471_s11 }
  0x8c   : > { %s555_s19 = sadd.s32 %s1472_s18, %s554_s13 }
  0x8d   : > { %s556_s16 = sld [smem:[#allocation4 + %s555_s19]] }
  0x93   : > { %s1410_s25 = sshll.u32 %s556_s16, 1 }
  0x94   : > { %s1178_s28 = scalar_lea.vmem %s1804_s1, %s1410_s25 }
  0x95   : > { %v1413_v9 = vld [vmem:[%s1178_s28 + $0x1] sm:$0x1] }
  0x96   : > { %1414 = vst [vmem:[%s1683_s3 + $0x9] sm:$0x1] %v1413_v9 }
  0x97   : > { %607 = vsyncadd [#allocation2 + $0x9], 16  ;;  %s608_s29 = sadd.s32 5, %s1674_s23 }
  0x98   : > { %s609_s30 = sld [smem:[#allocation4 + %s608_s29]] }
  0x9e   : > { %s1415_s4 = sshll.u32 %s609_s30, 1 }
  0x9f   : > { %s611_s5 = scalar_lea.vmem %s1804_s1, %s1415_s4 }
  0xa0   : > { %v632_v10 = vld [vmem:[%s611_s5] sm:$0x1] }
  0xa1   : > { %1417 = vst [vmem:[%s1683_s3 + $0xa] sm:$0x1] %v632_v10 }
  0xa2   : > { %659 = vsyncadd [#allocation2 + $0xa], 16  ;;  %s660_s9 = sshra.s32 %s608_s29, 7  ;;  %s665_s10 = sand.u32 127, %s608_s29 }
  0xa3   : > { %s1473_s8 = sshll.u32 %s660_s9, 7 }
  0xa4   : > { %s1474_s12 = sadd.s32 128, %s1473_s8 }
  0xa5   : > { %s666_s13 = sadd.s32 %s1474_s12, %s665_s10 }
  0xa6   : > { %s667_s11 = sld [smem:[#allocation4 + %s666_s13]] }
  0xac   : > { %s1419_s18 = sshll.u32 %s667_s11, 1 }
  0xad   : > { %s1190_s25 = scalar_lea.vmem %s1804_s1, %s1419_s18 }
  0xae   : > { %v1422_v11 = vld [vmem:[%s1190_s25 + $0x1] sm:$0x1] }
  0xaf   : > { %1423 = vst [vmem:[%s1683_s3 + $0xb] sm:$0x1] %v1422_v11 }
  0xb0   : > { %718 = vsyncadd [#allocation2 + $0xb], 16  ;;  %s719_s26 = sadd.s32 6, %s1674_s23 }
  0xb1   : > { %s720_s27 = sld [smem:[#allocation4 + %s719_s26]] }
  0xb7   : > { %s1424_s28 = sshll.u32 %s720_s27, 1 }
  0xb8   : > { %s722_s29 = scalar_lea.vmem %s1804_s1, %s1424_s28 }
  0xb9   : > { %v743_v12 = vld [vmem:[%s722_s29] sm:$0x1] }
  0xba   : > { %1426 = vst [vmem:[%s1683_s3 + $0xc] sm:$0x1] %v743_v12 }
  0xbb   : > { %770 = vsyncadd [#allocation2 + $0xc], 16  ;;  %s771_s6 = sshra.s32 %s719_s26, 7  ;;  %s776_s7 = sand.u32 127, %s719_s26 }
  0xbc   : > { %s1475_s5 = sshll.u32 %s771_s6, 7 }
  0xbd   : > { %s1476_s9 = sadd.s32 128, %s1475_s5 }
  0xbe   : > { %s777_s10 = sadd.s32 %s1476_s9, %s776_s7 }
  0xbf   : > { %s778_s8 = sld [smem:[#allocation4 + %s777_s10]] }
  0xc5   : > { %s1428_s12 = sshll.u32 %s778_s8, 1 }
  0xc6   : > { %s1202_s18 = scalar_lea.vmem %s1804_s1, %s1428_s12 }
  0xc7   : > { %v1431_v13 = vld [vmem:[%s1202_s18 + $0x1] sm:$0x1] }
  0xc8   : > { %1432 = vst [vmem:[%s1683_s3 + $0xd] sm:$0x1] %v1431_v13 }
  0xc9   : > { %829 = vsyncadd [#allocation2 + $0xd], 16  ;;  %s830_s19 = sadd.s32 7, %s1674_s23 }
  0xca   : > { %s831_s16 = sld [smem:[#allocation4 + %s830_s19]] }
  0xd0   : > { %s1433_s25 = sshll.u32 %s831_s16, 1 }
  0xd1   : > { %s833_s26 = scalar_lea.vmem %s1804_s1, %s1433_s25 }
  0xd2   : > { %v854_v14 = vld [vmem:[%s833_s26] sm:$0x1] }
  0xd3   : > { %1435 = vst [vmem:[%s1683_s3 + $0xe] sm:$0x1] %v854_v14 }
  0xd4   : > { %881 = vsyncadd [#allocation2 + $0xe], 16  ;;  %s882_s30 = sshra.s32 %s830_s19, 7  ;;  %s887_s4 = sand.u32 127, %s830_s19 }
  0xd5   : > { %s1477_s29 = sshll.u32 %s882_s30, 7 }
  0xd6   : > { %s1478_s6 = sadd.s32 128, %s1477_s29 }
  0xd7   : > { %s888_s7 = sadd.s32 %s1478_s6, %s887_s4 }
  0xd8   : > { %s889_s5 = sld [smem:[#allocation4 + %s888_s7]] }
  0xde   : > { %s1437_s9 = sshll.u32 %s889_s5, 1 }
  0xdf   : > { %s1214_s23 = scalar_lea.vmem %s1804_s1, %s1437_s9 }
  0xe0   : > { %v1440_v15 = vld [vmem:[%s1214_s23 + $0x1] sm:$0x1] }
  0xe1   : > { %1441 = vst [vmem:[%s1683_s3 + $0xf] sm:$0x1] %v1440_v15 }
  0xe2   : > { %940 = vsyncadd [#allocation2 + $0xf], 16 }
  0xe3   : > { %1566 = dma.done.wait [#allocation2], 16 }
  0xe4   : > { %1567 = vsyncadd [#allocation2], 4294967280 }
  0xe5   : > { %1568 = dma.done.wait [#allocation2 + $0x1], 16 }
  0xe6   : > { %1569 = vsyncadd [#allocation2 + $0x1], 4294967280 }
  0xe7   : > { %1570 = dma.done.wait [#allocation2 + $0x2], 16 }
  0xe8   : > { %1571 = vsyncadd [#allocation2 + $0x2], 4294967280 }
  0xe9   : > { %1572 = dma.done.wait [#allocation2 + $0x3], 16 }
  0xea   : > { %1573 = vsyncadd [#allocation2 + $0x3], 4294967280 }
  0xeb   : > { %1574 = dma.done.wait [#allocation2 + $0x4], 16 }
  0xec   : > { %1575 = vsyncadd [#allocation2 + $0x4], 4294967280 }
  0xed   : > { %1576 = dma.done.wait [#allocation2 + $0x5], 16 }
  0xee   : > { %1577 = vsyncadd [#allocation2 + $0x5], 4294967280 }
  0xef   : > { %1578 = dma.done.wait [#allocation2 + $0x6], 16 }
  0xf0   : > { %1579 = vsyncadd [#allocation2 + $0x6], 4294967280 }
  0xf1   : > { %1580 = dma.done.wait [#allocation2 + $0x7], 16 }
  0xf2   : > { %1581 = vsyncadd [#allocation2 + $0x7], 4294967280 }
  0xf3   : > { %1582 = dma.done.wait [#allocation2 + $0x8], 16 }
  0xf4   : > { %1583 = vsyncadd [#allocation2 + $0x8], 4294967280 }
  0xf5   : > { %1584 = dma.done.wait [#allocation2 + $0x9], 16 }
  0xf6   : > { %1585 = vsyncadd [#allocation2 + $0x9], 4294967280 }
  0xf7   : > { %1586 = dma.done.wait [#allocation2 + $0xa], 16 }
  0xf8   : > { %1587 = vsyncadd [#allocation2 + $0xa], 4294967280 }
  0xf9   : > { %1588 = dma.done.wait [#allocation2 + $0xb], 16 }
  0xfa   : > { %1589 = vsyncadd [#allocation2 + $0xb], 4294967280 }
  0xfb   : > { %1590 = dma.done.wait [#allocation2 + $0xc], 16 }
  0xfc   : > { %1591 = vsyncadd [#allocation2 + $0xc], 4294967280 }
  0xfd   : > { %1592 = dma.done.wait [#allocation2 + $0xd], 16 }
  0xfe   : > { %1593 = vsyncadd [#allocation2 + $0xd], 4294967280 }
  0xff   : > { %1594 = dma.done.wait [#allocation2 + $0xe], 16 }
 0x100   : > { %1595 = vsyncadd [#allocation2 + $0xe], 4294967280 }
 0x101   : > { %1596 = dma.done.wait [#allocation2 + $0xf], 16 }
 0x102   : > { %1597 = vsyncadd [#allocation2 + $0xf], 4294967280  ;;  %s1479_s12 = sshll.u32 %s1612_s0, 8  ;;  %s987_s19 = sshll.u32 %s1683_s3, 4  ;;  %s1762_s19 = int_to_ptr.vmem [resolvable:$true] %s987_s19 }
 0x103   : > { %s1759_s18 = scalar_lea.hbm %s1805_s2, %s1479_s12  ;;  %s1766_s16 = scalar_lea.sflag [#allocation6], %s51_s24 }
 0x104   : > { %s1526_s25 = scalar_lea.vmem %s1762_s19, 256  ;;  %s1615_s27 = smov [#allocation5]  }
 0x105   : > { %p1527_p13 = scmp.ne.s32.totalorder %s1762_s19, %s1526_s25  ;;  %s1530_s28 = sshll.u32 %s1615_s27, 4  ;;  %s1531_s28 = int_to_ptr.vmem [resolvable:$false] %s1530_s28 }
 0x106   : > { %s1532_s26 = scalar_lea.vmem %s1531_s28, 512  ;;  %p1533_p2 = scmp.lt.s32.totalorder %s1762_s19, %s1531_s28 }
 0x107   : > { %p1528_p0 = pnand %p1527_p13, %p1664_p9  ;;  %p1534_p3 = scmp.lt.s32.totalorder %s1532_s26, %s1526_s25 }
 0x109   : > { %p1529_p1 = pneg %p1528_p0  ;;  %p1535_p4 = por %p1534_p3, %p1533_p2 }
 0x10b   : > { %p1536_p5 = pnand %p1535_p4, %p1529_p1 }
 0x10d   : > { %1539 = shalt.err (!%p1536_p5)
}
 0x10e   : > { %s1540_s24 = scalar_lea.hbm %s1759_s18, 256  ;;  %s1544_s4 = scalar_lea.hbm %s1805_s2, 512 }
 0x10f   : > { %p1541_p6 = scmp.ne.s32.totalorder %s1759_s18, %s1540_s24  ;;  %p1545_p10 = scmp.lt.s32.totalorder %s1759_s18, %s1805_s2 }
 0x110   : > { %p1546_p12 = scmp.lt.s32.totalorder %s1544_s4, %s1540_s24 }
 0x111   : > { %p1542_p7 = pnand %p1541_p6, %p1664_p9 }
 0x112   : > { %p1547_p13 = por %p1546_p12, %p1545_p10 }
 0x113   : > { %p1543_p8 = pneg %p1542_p7 }
 0x115   : > { %p1548_p0 = pnand %p1547_p13, %p1543_p8 }
 0x117   : > { %1551 = shalt.err (!%p1548_p0)
}
 0x118   : > { %s1616_s7 = smov 32   ;;  %s1617_s5 = smov 2  }
 0x119   : > { %1480 = dma.vmem_to_hbm [thread:$0]  (%p1664_p9), %s1762_s19, 256, %s1759_s18, %s1766_s16, %s1616_s7, %s1616_s7, %s1617_s5  }
 0x11a PF: > { %p1486_p1 = scmp.ge.s32.totalorder %s1612_s0, 1  ;;  %s1002_s9 = sand.u32 1, %s1604_s14  }
 0x11b   : > { %s1003_s10 = scalar_lea.sflag [#allocation6], %s1002_s9 }
 0x11c   : > { %p1483_p2 = pnand %p1486_p1, %p1668_p11 }
 0x11e   : > { %p1484_p3 = pneg %p1483_p2 }
 0x120   : > { %1599 = dma.done.wait (%p1484_p3), %s1003_s10, 256  }
 0x121   : > { %1601 = vsyncadd (%p1484_p3), %s1003_s10, 4294967040  ;;  %p18_p4 = scmp.ge.s32.totalorder %s1653_s17, 3   ;;  %s1808_s14 = smov %s1608_s15 }
 0x122   : > { %s1809_s15 = smov %s1662_s20  ;;  %s1810_s0 = smov %s1653_s17 }
 0x123   :  { %20 = sbr.rel (!%p18_p4) target bundleno = 18 (0x12), region = 745 }
 0x128   :  { %1008 = vsyncpa [#allocation6], 1 }
 0x129   :  { %1010 = vsyncpa [#allocation6 + $0x1], 1 }
 0x12a   :  { %1011 = vsyncmov [#allocation2] }
 0x12d   :  { %s1012_s0 = vpop.sfrf %1011 }
 0x12e   :  { %p1447_p9 = scmp.ne.s32.totalorder %s1012_s0, 0 }
 0x130   :  { %1016 = shalt.err (%p1447_p9)  }
 0x131   :  { %1018 = vsyncmov [#allocation2 + $0x1] }
 0x134   :  { %s1019_s21 = vpop.sfrf %1018 }
 0x135   :  { %p1448_p11 = scmp.ne.s32.totalorder %s1019_s21, 0 }
 0x137   :  { %1023 = shalt.err (%p1448_p11)  }
 0x138   :  { %1025 = vsyncmov [#allocation2 + $0x2] }
 0x13b   :  { %s1026_s22 = vpop.sfrf %1025 }
 0x13c   :  { %p1449_p5 = scmp.ne.s32.totalorder %s1026_s22, 0 }
 0x13e   :  { %1030 = shalt.err (%p1449_p5)  }
 0x13f   :  { %1032 = vsyncmov [#allocation2 + $0x3] }
 0x142   :  { %s1033_s8 = vpop.sfrf %1032 }
 0x143   :  { %p1450_p6 = scmp.ne.s32.totalorder %s1033_s8, 0 }
 0x145   :  { %1037 = shalt.err (%p1450_p6)  }
 0x146   :  { %1039 = vsyncmov [#allocation2 + $0x4] }
 0x149   :  { %s1040_s17 = vpop.sfrf %1039 }
 0x14a   :  { %p1451_p7 = scmp.ne.s32.totalorder %s1040_s17, 0 }
 0x14c   :  { %1044 = shalt.err (%p1451_p7)  }
 0x14d   :  { %1046 = vsyncmov [#allocation2 + $0x5] }
 0x150   :  { %s1047_s1 = vpop.sfrf %1046 }
 0x151   :  { %p1452_p8 = scmp.ne.s32.totalorder %s1047_s1, 0 }
 0x153   :  { %1051 = shalt.err (%p1452_p8)  }
 0x154   :  { %1053 = vsyncmov [#allocation2 + $0x6] }
 0x157   :  { %s1054_s2 = vpop.sfrf %1053 }
 0x158   :  { %p1453_p10 = scmp.ne.s32.totalorder %s1054_s2, 0 }
 0x15a   :  { %1058 = shalt.err (%p1453_p10)  }
 0x15b   :  { %1060 = vsyncmov [#allocation2 + $0x7] }
 0x15e   :  { %s1061_s14 = vpop.sfrf %1060 }
 0x15f   :  { %p1454_p12 = scmp.ne.s32.totalorder %s1061_s14, 0 }
 0x161   :  { %1065 = shalt.err (%p1454_p12)  }
 0x162   :  { %1067 = vsyncmov [#allocation2 + $0x8] }
 0x165   :  { %s1068_s15 = vpop.sfrf %1067 }
 0x166   :  { %p1455_p13 = scmp.ne.s32.totalorder %s1068_s15, 0 }
 0x168   :  { %1072 = shalt.err (%p1455_p13)  }
 0x169   :  { %1074 = vsyncmov [#allocation2 + $0x9] }
 0x16c   :  { %s1075_s20 = vpop.sfrf %1074 }
 0x16d   :  { %p1456_p0 = scmp.ne.s32.totalorder %s1075_s20, 0 }
 0x16f   :  { %1079 = shalt.err (%p1456_p0)  }
 0x170   :  { %1081 = vsyncmov [#allocation2 + $0xa] }
 0x173   :  { %s1082_s23 = vpop.sfrf %1081 }
 0x174   :  { %p1457_p1 = scmp.ne.s32.totalorder %s1082_s23, 0 }
 0x176   :  { %1086 = shalt.err (%p1457_p1)  }
 0x177   :  { %1088 = vsyncmov [#allocation2 + $0xb] }
 0x17a   :  { %s1089_s12 = vpop.sfrf %1088 }
 0x17b   :  { %p1458_p2 = scmp.ne.s32.totalorder %s1089_s12, 0 }
 0x17d   :  { %1093 = shalt.err (%p1458_p2)  }
 0x17e   :  { %1095 = vsyncmov [#allocation2 + $0xc] }
 0x181   :  { %s1096_s13 = vpop.sfrf %1095 }
 0x182   :  { %p1459_p3 = scmp.ne.s32.totalorder %s1096_s13, 0 }
 0x184   :  { %1100 = shalt.err (%p1459_p3)  }
 0x185   :  { %1102 = vsyncmov [#allocation2 + $0xd] }
 0x188   :  { %s1103_s11 = vpop.sfrf %1102 }
 0x189   :  { %p1460_p4 = scmp.ne.s32.totalorder %s1103_s11, 0 }
 0x18b   :  { %1107 = shalt.err (%p1460_p4)  }
 0x18c   :  { %1109 = vsyncmov [#allocation2 + $0xe] }
 0x18f   :  { %s1110_s18 = vpop.sfrf %1109 }
 0x190   :  { %p1461_p9 = scmp.ne.s32.totalorder %s1110_s18, 0 }
 0x192   :  { %1114 = shalt.err (%p1461_p9)  }
 0x193   :  { %1116 = vsyncmov [#allocation2 + $0xf] }
 0x196   :  { %s1117_s19 = vpop.sfrf %1116 }
 0x197   :  { %p1462_p11 = scmp.ne.s32.totalorder %s1117_s19, 0 }
 0x199   :  { %1121 = shalt.err (%p1462_p11)  }

</bundles_post_ra>
